<compile_context>
chip_gen: v6e
topology: v6e:2x2x1
jax: 0.10.0
libtpu: 0.0.40
codegen_flags: <defaults>
</compile_context>

<pallas_src>
import jax
import jax.numpy as jnp
import numpy as np
from jax.experimental import pallas as pl
from jax.experimental.pallas import tpu as pltpu

BN_EPS = 1e-5
LANES = 128


def _round_up(x, m):
    return (x + m - 1) // m * m


def _pick_super_rows(Ho, Wo, Kp1, Cpad, vmem_budget=40 * 1024 * 1024):
    """Conv rows per pass-1 tile: even (for 2x2 pool fusion), TM=rows*Wo a multiple
    of 8 (sublane alignment), ~512 matmul rows per tile (HBM roofline), capped at
    one (padded) image and at a VMEM budget that also fits v7x's 64 MiB VMEM."""
    g = 2
    while (g * Wo) % 8 != 0:          # smallest even row granularity keeping TM%8==0
        g += 2                        # g in {2, 4, 8}
    sr = max(g, (512 // max(Wo, 1)) // g * g)
    sr = min(sr, _round_up(Ho, g))    # never more than one padded image per tile
    sr = max(sr, g)

    def tile_bytes(r):
        tm = r * Wo
        return (2 * tm * Kp1 * 2                               # dbl-buffered bf16 LHS
                + 2 * Kp1 * Cpad * 2                           # bf16 weights
                + 2 * 2 * (r // 2) * max(Wo // 2, 1) * Cpad * 2  # mx+mn bf16 outputs
                + 2 * 8 * Cpad * 4)                            # stats

    while sr > g and tile_bytes(sr) > vmem_budget:
        sr -= g
    return sr


def conv_block_forward(x_nchw, weight, bias, gamma, beta, *, stride=1, padding=0):
    """ConvBlock.forward. x_nchw: (N, Cin, H, W); weight: (Cout, Cin, KH, KW)."""
    N, Cin, H, W = x_nchw.shape
    Cout, _, KH, KW = weight.shape

    # ---- glue: NCHW -> NHWC (early bf16 cast halves im2col HBM traffic), im2col ----
    x = jnp.transpose(x_nchw, (0, 2, 3, 1)).astype(jnp.bfloat16)
    if padding:
        x = jnp.pad(x, ((0, 0), (padding, padding), (padding, padding), (0, 0)))
    Hin, Win = x.shape[1], x.shape[2]
    Ho = (Hin - KH) // stride + 1
    Wo = (Win - KW) // stride + 1
    Hp, Wp = Ho // 2, Wo // 2                       # pooled output size (floor mode)

    # TODO(synk): im2col still reads x KH*KW times; a (kh,kw) "arbitrary" reduction
    # grid with per-tap windowed BlockSpecs would remove that read amplification.
    cols = []
    for kh in range(KH):
        for kw in range(KW):
            sl = x[:, kh:kh + stride * (Ho - 1) + 1:stride,
                      kw:kw + stride * (Wo - 1) + 1:stride, :]
            cols.append(sl)
    patches = jnp.concatenate(cols, axis=-1)        # (N, Ho, Wo, K) bf16
    K = KH * KW * Cin
    # Fold the conv bias into the matmul via an all-ones column (zero on padded rows).
    patches = jnp.concatenate(
        [patches, jnp.ones((N, Ho, Wo, 1), jnp.bfloat16)], axis=-1)
    Kp1 = K + 1

    Cpad = _round_up(Cout, LANES)
    SR = _pick_super_rows(Ho, Wo, Kp1, Cpad)        # conv rows per tile (even)
    SR2 = SR // 2                                   # pooled rows per tile

    Ho_pad = _round_up(Ho, SR)                      # per-image row padding
    patches = jnp.pad(patches, ((0, 0), (0, Ho_pad - Ho), (0, 0), (0, 0)))
    Mp = N * Ho_pad * Wo                            # padded row count
    M = N * Ho * Wo                                 # true row count (BN denominator)
    patches = patches.reshape(Mp, Kp1)

    # Weights: (Cout, Cin, KH, KW) -> (K, Cout), bias appended, lane-dense channels.
    w2 = jnp.transpose(weight, (2, 3, 1, 0)).reshape(K, Cout).astype(jnp.float32)
    w2 = jnp.concatenate([w2, bias.reshape(1, Cout).astype(jnp.float32)], axis=0)
    w2 = jnp.pad(w2, ((0, 0), (0, Cpad - Cout))).astype(jnp.bfloat16)   # (Kp1, Cpad)

    TM = SR * Wo                                    # matmul rows per tile (mult of 8)
    n_tiles = Mp // TM                              # keep >=2 / even for v7x 2-TC split

    # ---- pass 1: conv (MXU) + ReLU + fused 2x2/2 pool + partial BN statistics ------
    def conv_relu_pool_stats_kernel(p_ref, w_ref, mx_ref, mn_ref, stat_ref):
        acc = jnp.dot(p_ref[...], w_ref[...], preferred_element_type=jnp.float32)
        acc = jnp.maximum(acc, 0.0)                                 # ReLU
        # partial BN stats; zero-padded rows contribute exactly 0.
        s = jnp.sum(acc, axis=0, keepdims=True)                     # (1, Cpad)
        q = jnp.sum(acc * acc, axis=0, keepdims=True)               # (1, Cpad)
        rid = jax.lax.broadcasted_iota(jnp.int32, (8, Cpad), 0)
        stat_ref[...] = jnp.where(rid == 0, s, 0.0) + jnp.where(rid == 1, q, 0.0)
        # fused 2x2 stride-2 pool on raw post-ReLU activations (BN affine applied
        # later as scale_pos*max + scale_neg*min + shift).
        a = acc.reshape(SR, Wo, Cpad)[:, :2 * Wp, :]                # drop odd column
        a = a.reshape(SR2, 2, Wp, 2, Cpad)
        mx_ref[...] = jnp.max(a, axis=(1, 3)).astype(mx_ref.dtype)  # (SR2, Wp, Cpad)
        mn_ref[...] = jnp.min(a, axis=(1, 3)).astype(mn_ref.dtype)

    mx, mn, stats = pl.pallas_call(
        conv_relu_pool_stats_kernel,
        grid=(n_tiles,),
        in_specs=[
            pl.BlockSpec((TM, Kp1), lambda i: (i, 0)),
            pl.BlockSpec((Kp1, Cpad), lambda i: (0, 0)),
        ],
        out_specs=(
            pl.BlockSpec((SR2, Wp, Cpad), lambda i: (i, 0, 0)),
            pl.BlockSpec((SR2, Wp, Cpad), lambda i: (i, 0, 0)),
            pl.BlockSpec((8, Cpad), lambda i: (i, 0)),
        ),
        out_shape=(
            jax.ShapeDtypeStruct((n_tiles * SR2, Wp, Cpad), jnp.bfloat16),
            jax.ShapeDtypeStruct((n_tiles * SR2, Wp, Cpad), jnp.bfloat16),
            jax.ShapeDtypeStruct((n_tiles * 8, Cpad), jnp.float32),
        ),
        compiler_params=pltpu.CompilerParams(
            dimension_semantics=("parallel",),
            vmem_limit_bytes=48 * 1024 * 1024),
    )(patches, w2)

    # ---- glue: combine per-tile stats -> per-channel affine coefficients ------------
    stats = stats.reshape(n_tiles, 8, Cpad)
    tot_sum = jnp.sum(stats[:, 0, :], axis=0)
    tot_ssq = jnp.sum(stats[:, 1, :], axis=0)
    mean = tot_sum / M
    var = jnp.maximum(tot_ssq / M - mean * mean, 0.0)   # biased var (BN normalization)
    # TODO(synk): E[x^2]-E[x]^2 can lose precision at very large M; use a shifted
    # sumsq / Welford combine if this block is used at scale.  running_mean/var buffer
    # updates (training side-effect) are not reproduced (don't affect forward output).
    inv_std = jax.lax.rsqrt(var + BN_EPS)
    gamma_p = jnp.pad(gamma.astype(jnp.float32), (0, Cpad - Cout))  # padded channels
    beta_p = jnp.pad(beta.astype(jnp.float32), (0, Cpad - Cout))    # stay 0
    scale = gamma_p * inv_std
    shift = (beta_p - mean * scale).reshape(1, Cpad)
    scale_pos = jnp.maximum(scale, 0.0).reshape(1, Cpad)    # sign select hoisted
    scale_neg = jnp.minimum(scale, 0.0).reshape(1, Cpad)

    # ---- pass 2: per-channel BN affine on the (quarter-size) pooled tensor ----------
    Mpool = n_tiles * SR2 * Wp                      # = N * (Ho_pad//2) * Wp
    mx_flat = mx.reshape(Mpool, Cpad)
    mn_flat = mn.reshape(Mpool, Cpad)
    TP = min(_round_up(Mpool, 8), 512)              # coarse tiles: low per-step overhead
    Mpool_pad = _round_up(Mpool, TP)
    if Mpool_pad != Mpool:
        mx_flat = jnp.pad(mx_flat, ((0, Mpool_pad - Mpool), (0, 0)))
        mn_flat = jnp.pad(mn_flat, ((0, Mpool_pad - Mpool), (0, 0)))

    def bn_affine_kernel(mx_ref, mn_ref, sp_ref, sn_ref, sh_ref, o_ref):
        o_ref[...] = (mx_ref[...].astype(jnp.float32) * sp_ref[...]
                      + mn_ref[...].astype(jnp.float32) * sn_ref[...]
                      + sh_ref[...])

    pooled = pl.pallas_call(
        bn_affine_kernel,
        grid=(Mpool_pad // TP,),
        in_specs=[
            pl.BlockSpec((TP, Cpad), lambda i: (i, 0)),
            pl.BlockSpec((TP, Cpad), lambda i: (i, 0)),
            pl.BlockSpec((1, Cpad), lambda i: (0, 0)),
            pl.BlockSpec((1, Cpad), lambda i: (0, 0)),
            pl.BlockSpec((1, Cpad), lambda i: (0, 0)),
        ],
        out_specs=pl.BlockSpec((TP, Cpad), lambda i: (i, 0)),
        out_shape=jax.ShapeDtypeStruct((Mpool_pad, Cpad), jnp.float32),
        compiler_params=pltpu.CompilerParams(
            dimension_semantics=("parallel",),
            vmem_limit_bytes=48 * 1024 * 1024),
    )(mx_flat, mn_flat, scale_pos, scale_neg, shift)

    pooled = pooled[:Mpool].reshape(N, Ho_pad // 2, Wp, Cpad)[:, :Hp, :, :Cout]
    # TODO(synk): if ConvBlocks are chained, keep NHWC/Cpad between blocks and only
    # transpose to NCHW at the model boundary.
    return jnp.transpose(pooled, (0, 3, 1, 2))      # back to NCHW


def reference(x, weight, bias, gamma, beta, *, stride=1, padding=0):
    """Pure-JAX f32 reference of the same forward pass (validation only)."""
    y = jax.lax.conv_general_dilated(
        x, weight, (stride, stride), [(padding, padding), (padding, padding)],
        dimension_numbers=("NCHW", "OIHW", "NCHW"))
    y = y + bias.reshape(1, -1, 1, 1)
    y = jnp.maximum(y, 0.0)
    mean = jnp.mean(y, axis=(0, 2, 3), keepdims=True)
    var = jnp.mean((y - mean) ** 2, axis=(0, 2, 3), keepdims=True)
    y = (y - mean) * jax.lax.rsqrt(var + BN_EPS) * gamma.reshape(1, -1, 1, 1) \
        + beta.reshape(1, -1, 1, 1)
    y = jax.lax.reduce_window(y, -jnp.inf, jax.lax.max,
                              (1, 1, 2, 2), (1, 1, 2, 2), "VALID")
    return y


if __name__ == "__main__":
    key = jax.random.PRNGKey(0)
    N, Cin, H, W = 2, 4, 16, 16
    Cout, Ksz = 8, 3

    k_x, k_w, k_b = jax.random.split(key, 3)
    x = jax.random.normal(k_x, (N, Cin, H, W), jnp.float32)
    fan_in = Cin * Ksz * Ksz
    weight = jax.random.normal(k_w, (Cout, Cin, Ksz, Ksz), jnp.float32) / np.sqrt(fan_in)
    bias = 0.1 * jax.random.normal(k_b, (Cout,), jnp.float32)
    gamma = 1.0 + 0.1 * jnp.arange(Cout, dtype=jnp.float32)   # BN weight
    beta = 0.05 * jnp.arange(Cout, dtype=jnp.float32)         # BN bias

    out = conv_block_forward(x, weight, bias, gamma, beta, stride=1, padding=0)
    out = jax.block_until_ready(out)

    assert out.shape == (N, Cout, 7, 7), out.shape
    ref = reference(x, weight, bias, gamma, beta, stride=1, padding=0)
    # bf16 MXU operands + bf16 pooled slab vs a pure-f32 reference -> loose tolerance.
    np.testing.assert_allclose(np.asarray(out), np.asarray(ref), atol=6e-2, rtol=2e-2)
    print("KERNEL_OK")
</pallas_src>

<mosaic_0001>
module attributes {stable_mosaic.version = 11 : i64} {
  func.func @conv_relu_pool_stats_kernel(%arg0: i32, %arg1: memref<224x37xbf16, #tpu.memory_space<vmem>>, %arg2: memref<37x128xbf16, #tpu.memory_space<vmem>>, %arg3: memref<8x7x128xbf16, #tpu.memory_space<vmem>>, %arg4: memref<8x7x128xbf16, #tpu.memory_space<vmem>>, %arg5: memref<8x128xf32, #tpu.memory_space<vmem>>) attributes {dimension_semantics = [#tpu.dimension_semantics<parallel>], iteration_bounds = array<i64: 2>, scalar_prefetch = 0 : i64, scratch_operands = 0 : i64, tpu.core_type = #tpu.core_type<tc>, window_params = [{transform_indices = @transform_0, window_bounds = array<i64: 224, 37>}, {pipeline_mode = #tpu.pipeline_mode<synchronous>, transform_indices = @transform_1, window_bounds = array<i64: 37, 128>}, {transform_indices = @transform_2, window_bounds = array<i64: 8, 7, 128>}, {transform_indices = @transform_3, window_bounds = array<i64: 8, 7, 128>}, {transform_indices = @transform_4, window_bounds = array<i64: 8, 128>}]} {
    %c0 = arith.constant 0 : index
    %c0_0 = arith.constant 0 : index
    %0 = vector.load %arg1[%c0, %c0_0] : memref<224x37xbf16, #tpu.memory_space<vmem>>, vector<224x37xbf16>
    %c0_1 = arith.constant 0 : index
    %c0_2 = arith.constant 0 : index
    %1 = vector.load %arg2[%c0_1, %c0_2] : memref<37x128xbf16, #tpu.memory_space<vmem>>, vector<37x128xbf16>
    %cst = arith.constant dense<0.000000e+00> : vector<224x128xf32>
    %2 = tpu.matmul %0, %1, %cst {dimension_numbers = #tpu.dot_dimension_numbers<[1], [0], [0], [1], [0, 0, 1, 1], [], []>} : vector<224x37xbf16>, vector<37x128xbf16>, vector<224x128xf32> -> vector<224x128xf32>
    %cst_3 = arith.constant 0.000000e+00 : f32
    %3 = vector.broadcast %cst_3 : f32 to vector<224x128xf32>
    %4 = arith.maximumf %2, %3 : vector<224x128xf32>
    %cst_4 = arith.constant dense<0.000000e+00> : vector<128xf32>
    %5 = vector.multi_reduction <add>, %4, %cst_4 [0] : vector<224x128xf32> to vector<128xf32>
    %6 = vector.shape_cast %5 : vector<128xf32> to vector<1x128xf32>
    %7 = arith.mulf %4, %4 : vector<224x128xf32>
    %cst_5 = arith.constant dense<0.000000e+00> : vector<128xf32>
    %8 = vector.multi_reduction <add>, %7, %cst_5 [0] : vector<224x128xf32> to vector<128xf32>
    %9 = vector.shape_cast %8 : vector<128xf32> to vector<1x128xf32>
    %10 = tpu.iota {dimensions = array<i32: 0>} : vector<8x128xi32>
    %c0_i32 = arith.constant 0 : i32
    %11 = vector.broadcast %c0_i32 : i32 to vector<8x128xi32>
    %12 = arith.cmpi eq, %10, %11 : vector<8x128xi32>
    %cst_6 = arith.constant 0.000000e+00 : f32
    %13 = vector.shape_cast %6 : vector<1x128xf32> to vector<1x128xf32>
    %14 = vector.broadcast %13 : vector<1x128xf32> to vector<8x128xf32>
    %15 = vector.broadcast %cst_6 : f32 to vector<8x128xf32>
    %16 = arith.select %12, %14, %15 : vector<8x128xi1>, vector<8x128xf32>
    %c1_i32 = arith.constant 1 : i32
    %17 = vector.broadcast %c1_i32 : i32 to vector<8x128xi32>
    %18 = arith.cmpi eq, %10, %17 : vector<8x128xi32>
    %cst_7 = arith.constant 0.000000e+00 : f32
    %19 = vector.shape_cast %9 : vector<1x128xf32> to vector<1x128xf32>
    %20 = vector.broadcast %19 : vector<1x128xf32> to vector<8x128xf32>
    %21 = vector.broadcast %cst_7 : f32 to vector<8x128xf32>
    %22 = arith.select %18, %20, %21 : vector<8x128xi1>, vector<8x128xf32>
    %23 = arith.addf %16, %22 : vector<8x128xf32>
    %c0_8 = arith.constant 0 : index
    %c0_9 = arith.constant 0 : index
    %24 = vector.load %arg5[%c0_8, %c0_9] : memref<8x128xf32, #tpu.memory_space<vmem>>, vector<8x128xf32>
    tpu.vector_store %arg5[%c0_8, %c0_9], %23 {strides = array<i32>} : memref<8x128xf32, #tpu.memory_space<vmem>>, vector<8x128xf32>,
    %25 = vector.shape_cast %4 : vector<224x128xf32> to vector<16x14x128xf32>
    %26 = vector.shape_cast %25 : vector<16x14x128xf32> to vector<8x2x7x2x128xf32>
    %cst_10 = arith.constant dense<0xFF800000> : vector<8x7x128xf32>
    %27 = vector.multi_reduction <maximumf>, %26, %cst_10 [1, 3] : vector<8x2x7x2x128xf32> to vector<8x7x128xf32>
    %28 = arith.truncf %27 : vector<8x7x128xf32> to vector<8x7x128xbf16>
    %c0_11 = arith.constant 0 : index
    %c0_12 = arith.constant 0 : index
    %c0_13 = arith.constant 0 : index
    %29 = vector.load %arg3[%c0_11, %c0_12, %c0_13] : memref<8x7x128xbf16, #tpu.memory_space<vmem>>, vector<8x7x128xbf16>
    tpu.vector_store %arg3[%c0_11, %c0_12, %c0_13], %28 {strides = array<i32>} : memref<8x7x128xbf16, #tpu.memory_space<vmem>>, vector<8x7x128xbf16>,
    %cst_14 = arith.constant dense<0x7F800000> : vector<8x7x128xf32>
    %30 = vector.multi_reduction <minimumf>, %26, %cst_14 [1, 3] : vector<8x2x7x2x128xf32> to vector<8x7x128xf32>
    %31 = arith.truncf %30 : vector<8x7x128xf32> to vector<8x7x128xbf16>
    %c0_15 = arith.constant 0 : index
    %c0_16 = arith.constant 0 : index
    %c0_17 = arith.constant 0 : index
    %32 = vector.load %arg4[%c0_15, %c0_16, %c0_17] : memref<8x7x128xbf16, #tpu.memory_space<vmem>>, vector<8x7x128xbf16>
    tpu.vector_store %arg4[%c0_15, %c0_16, %c0_17], %31 {strides = array<i32>} : memref<8x7x128xbf16, #tpu.memory_space<vmem>>, vector<8x7x128xbf16>,
    return
  }
  func.func @transform_0(%arg0: i32) -> (i32, i32) {
    %c0_i32 = arith.constant 0 : i32
    %c0_i32_0 = arith.constant 0 : i32
    return %arg0, %c0_i32 : i32, i32
  }
  func.func @transform_1(%arg0: i32) -> (i32, i32) {
    %c0_i32 = arith.constant 0 : i32
    %c0_i32_0 = arith.constant 0 : i32
    %c0_i32_1 = arith.constant 0 : i32
    return %c0_i32, %c0_i32_0 : i32, i32
  }
  func.func @transform_2(%arg0: i32) -> (i32, i32, i32) {
    %c0_i32 = arith.constant 0 : i32
    %c0_i32_0 = arith.constant 0 : i32
    %c0_i32_1 = arith.constant 0 : i32
    return %arg0, %c0_i32, %c0_i32_0 : i32, i32, i32
  }
  func.func @transform_3(%arg0: i32) -> (i32, i32, i32) {
    %c0_i32 = arith.constant 0 : i32
    %c0_i32_0 = arith.constant 0 : i32
    %c0_i32_1 = arith.constant 0 : i32
    return %arg0, %c0_i32, %c0_i32_0 : i32, i32, i32
  }
  func.func @transform_4(%arg0: i32) -> (i32, i32) {
    %c0_i32 = arith.constant 0 : i32
    %c0_i32_0 = arith.constant 0 : i32
    return %arg0, %c0_i32 : i32, i32
  }
}

</mosaic_0001>

<bundles_post_ra>
// kernel: tpu_custom_call.1
= control target key start
LH: loop header
LB: loop body
LE: loop exit
PB: predicated region body
PF: predicated region fallthrough
CT: control target
= control target key end

     0   :  { %10 = vsyncpa [#allocation3], 0  ;;  %s5044_s0 = inlined_call_operand.vmem [shape: bf16[448,37], index: 0, kind: input, shape index: {}]   ;;  %s5045_s1 = inlined_call_operand.vmem [shape: bf16[37,128], index: 1, kind: input, shape index: {}]   ;;  %s5046_s2 = inlined_call_operand.vmem [shape: bf16[16,7,128], index: 2, kind: output, shape index: {0}]   ;;  %s5047_s3 = inlined_call_operand.vmem [shape: bf16[16,7,128], index: 3, kind: output, shape index: {1}]   ;;  %s5048_s4 = inlined_call_operand.hbm [shape: f32[16,128], index: 4, kind: output, shape index: {2}]  }
   0x1   :  { %12 = vsyncpa [#allocation3 + $0x1], 0  ;;  %s3653_s15 = smov 0   ;;  %s3655_s16 = smov 0  }
   0x2   :  { %s3657_s17 = smov 0   ;;  %s3659_s18 = smov 0  }
   0x3 LB: > { %s3674_s19 = sadd.s32 4294967295, %s3623_s18   ;;  %s3179_s20 = sadd.s32 4294967294, %s3623_s18   ;;  %s3623_s18 = sphi %s3659_s18, %s5146_s18   ;;  %s3619_s17 = sphi %s3657_s17, %s5145_s17   ;;  %s3615_s16 = sphi %s3655_s16, %s5144_s16   ;;  %s3611_s15 = sphi %s3653_s15, %s5143_s15  }
   0x4   : > { %s3678_s21 = sadd.s32 1, %s3623_s18   ;;  %s124_s22 = sadd.s32 1, %s3619_s17 }
   0x5   : > { %s121_s23 = ssub.s32 %s3623_s18, %s3678_s21  ;;  %p134_p0 = scmp.ne.s32.totalorder %s3619_s17, %s3615_s16 }
   0x6   : > { %p122_p1 = scmp.eq.s32.totalorder %s121_s23, 0  ;;  %p135_p2 = scmp.eq.s32.totalorder %s3674_s19, 1 }
   0x7   : > { %p140_p3 = scmp.ne.s32.totalorder %s3615_s16, %s3611_s15  ;;  %p141_p4 = scmp.eq.s32.totalorder %s3179_s20, 1 }
   0x8   : > { %s3689_s24 = scalar_select %p122_p1, %s3619_s17, %s124_s22  }
   0x9   : > { %p3691_p5 = por %p135_p2, %p134_p0  ;;  %p3695_p6 = por %p141_p4, %p140_p3 }
   0xa   : > { %p3182_p7 = scmp.ge.s32.totalorder %s3623_s18, 1  ;;  %p171_p8 = scmp.lt.s32.totalorder %s3623_s18, 3 }
   0xc   : > { %p172_p9 = pnand %p3182_p7, %p171_p8 }
   0xe   : > { %175 = sbr.rel (%p172_p9) target bundleno = 656 (0x290), region = 28 }
  0x13   : > { %v3546_v0 = vld [vmem:[%s5045_s1 + $0x10] ss:$0 sps:$4 sm:$0x77]   ;;  %vm387_vm0 = vcmask 1041408   ;;  %vm388_vm1 = vcmask 1042432   ;;  %v3625_v1 = vmov 65535   ;;  %v661_v21 = vlaneseq }
  0x14   : > { %v389_v2 = vsel %vm387_vm0, 4294967295, %v3625_v1  ;;  %s207_s29 = smul.u32 28, %s3674_s19  ;;  %v3547_v5 = vld [vmem:[%s5045_s1 + $0x8] sm:$0xff]   ;;  %v3548_v6 = vld [vmem:[%s5045_s1] sm:$0xff]   ;;  %vm344_vm2 = vcmask 302080   ;;  %s3185_s12 = sshll.u32 %s3674_s19, 3 }
  0x15   : > { %v390_v3 = vsel %vm388_vm1, %v389_v2, 0  ;;  %v3626_v22 = vmov 1983009808   ;;  %v3745_v24 = vshrl.u32 %v661_v21, 7  ;;  %vm2069_vm3 = vcmask 1041409   ;;  %p3916_p11 = scmp.lt.s32.totalorder %s3185_s12, 15 }
  0x16   : > { %v392_v4 = vand.u32 %v3546_v0, %v390_v3  ;;  %p208_p10 = scmp.lt.s32.totalorder %s207_s29, 55  ;;  %v699_v23 = vunpack.c.l.s4 %v3626_v22  ;;  %vm2071_vm4 = vcmask 1042434   ;;  %vm2073_vm5 = vcmask 1043459   ;;  %s204_s30 = sand.u32 1, %s3615_s16  }
  0x17   : > { %5066 = vst [vmem:[#allocation5_spill] sm:$0xff] %v3745_v24  ;;  %vm2075_vm6 = vcmask 1044484   ;;  %vm2077_vm7 = vcmask 1045509   ;;  %vm2079_vm8 = vcmask 1046534   ;;  %vm2139_vm9 = vcmask 1043456   ;;  %s5150_s12 = smov (!%p3916_p11, %s3185_s12), 15 }
  0x18   : > { %3465 = vmatprep.subr.bf16.mxu0 %v392_v4  ;;  %3499 = vmatprep.subr.bf16.mxu1 %v392_v4  ;;  %s5148_s29 = smov (!%p208_p10, %s207_s29), 55  ;;  %v700_v25 = vunpack.c.0.s8 %v699_v23  ;;  %vm2140_vm10 = vsmask.f32 3328  ;;  %s3186_s14 = sshll.u32 %s5150_s12, 2 }
  0x19   : > { %3466 = vmatpush3.bf16.msra.mxu0 %v392_v4  ;;  %3502 = vmatpush3.bf16.msra.mxu1 %v392_v4  ;;  %s3184_s8 = sshll.u32 %s5148_s29, 2  ;;  %s3965_s23 = scalar_lea.vmem %s5046_s2, %s3186_s14  ;;  %vm3993_vm11 = vmand %vm2139_vm9, %vm2140_vm10 }
  0x1a   : > { %3467 = vmatprep.subr.bf16.mxu0 %v3547_v5  ;;  %3500 = vmatprep.subr.bf16.mxu1 %v3547_v5  ;;  %s3715_s11 = scalar_lea.vmem %s5044_s0, %s3184_s8  ;;  %v3748_v26 = vsub.s32 %v700_v25, %v3745_v24  ;;  %s3970_s29 = scalar_lea.vmem %s5047_s3, %s3186_s14 }
  0x1b   : > { %v3549_v7 = vld [vmem:[%s3715_s11] sm:$0xff]   ;;  %v3550_v8 = vld [vmem:[%s3715_s11 + $0x8] sm:$0xff]   ;;  %v3553_v11 = vld [vmem:[%s3715_s11 + $0x10] sm:$0xff]   ;;  %s4989_s5 = sshll.u32 %s204_s30, 3  ;;  %s3333_s6 = sshll.u32 %s3674_s19, 7 }
  0x1c   : > { %3471 = vmatprep.mubr.msk.bf16.mxu0 %vm344_vm2, %v3549_v7  ;;  %v3551_v9 = vld [vmem:[%s3715_s11 + $0x40] sm:$0xff]   ;;  %v3552_v10 = vld [vmem:[%s3715_s11 + $0x48] sm:$0xff]   ;;  %v3555_v12 = vld [vmem:[%s3715_s11 + $0x50] sm:$0xff]   ;;  %s206_s7 = scalar_lea.vmem [#allocation2], %s4989_s5  ;;  %s3049_s12 = scalar_lea.sflag [#allocation3], %s204_s30 }
  0x1d   : > { %3468 = vmatpush3.bf16.msra.mxu0 %v3547_v5  ;;  %3503 = vmatpush3.bf16.msra.mxu1 %v3547_v5  ;;  %v3554_v13 = vld [vmem:[%s3715_s11 + $0x18] sm:$0xff]   ;;  %v3557_v15 = vld [vmem:[%s3715_s11 + $0x20] sm:$0xff]   ;;  %v3558_v17 = vld [vmem:[%s3715_s11 + $0x28] sm:$0xff]   ;;  %s3070_s8 = sshll.u32 %s206_s7, 4  ;;  %s3627_s13 = smov [#allocation2]   ;;  %s3071_s8 = int_to_ptr.vmem [resolvable:$true] %s3070_s8 }
  0x1e   : > { %3469 = vmatprep.subr.bf16.mxu0 %v3548_v6  ;;  %3501 = vmatprep.subr.bf16.mxu1 %v3548_v6  ;;  %v3556_v14 = vld [vmem:[%s3715_s11 + $0x58] sm:$0xff]   ;;  %v3561_v16 = vld [vmem:[%s3715_s11 + $0x60] sm:$0xff]   ;;  %v3562_v18 = vld [vmem:[%s3715_s11 + $0x68] sm:$0xff]   ;;  %s3563_s19 = scalar_lea.vmem %s3071_s8, 128  ;;  %s3567_s14 = sshll.u32 %s3627_s13, 4  ;;  %s3568_s14 = int_to_ptr.vmem [resolvable:$false] %s3567_s14 }
  0x1f   : > { %3487 = vmatprep.mubr.msk.bf16.mxu1 %vm344_vm2, %v3551_v9  ;;  %v3559_v19 = vld [vmem:[%s3715_s11 + $0x30] sm:$0xff]   ;;  %v3560_v20 = vld [vmem:[%s3715_s11 + $0x38] sm:$0xff]   ;;  %s5006_s11 = scalar_lea.hbm %s5048_s4, %s3333_s6  ;;  %p3564_p12 = scmp.ne.s32.totalorder %s3071_s8, %s3563_s19 }
  0x20   : > { %s3569_s20 = scalar_lea.vmem %s3568_s14, 256  ;;  %p3570_p1 = scmp.lt.s32.totalorder %s3071_s8, %s3568_s14 }
  0x21   : > { %3470 = vmatpush3.bf16.msra.mxu0 %v3548_v6  ;;  %3504 = vmatpush3.bf16.msra.mxu1 %v3548_v6  ;;  %p3565_p13 = pnand %p3564_p12, %p3691_p5  ;;  %p3571_p2 = scmp.lt.s32.totalorder %s3569_s20, %s3563_s19 }
  0x23   : > { %p3566_p0 = pneg %p3565_p13  ;;  %p3572_p3 = por %p3571_p2, %p3570_p1 }
  0x24   : > { %3472 = vmatmul.mubr.msk.bf16.vlgmr.msra.gmra.mxu0 %vm344_vm2, %v3550_v8  ;;  %3488 = vmatmul.mubr.msk.bf16.vlgmr.msra.gmra.mxu1 %vm344_vm2, %v3552_v10 }
  0x25   : > { %3475 = vmatprep.mubr.msk.bf16.mxu0 %vm344_vm2, %v3553_v11  ;;  %3491 = vmatprep.mubr.msk.bf16.mxu1 %vm344_vm2, %v3555_v12  ;;  %p3573_p4 = pnand %p3572_p3, %p3566_p0 }
  0x2c   : > { %3476 = vmatmul.mubr.msk.bf16.gmra.mxu0 %vm344_vm2, %v3554_v13  ;;  %3492 = vmatmul.mubr.msk.bf16.gmra.mxu1 %vm344_vm2, %v3556_v14 }
  0x2d   : > { %3479 = vmatprep.mubr.msk.bf16.mxu0 %vm344_vm2, %v3557_v15  ;;  %3495 = vmatprep.mubr.msk.bf16.mxu1 %vm344_vm2, %v3561_v16 }
  0x34   : > { %3480 = vmatmul.mubr.msk.bf16.gmra.mxu0 %vm344_vm2, %v3558_v17  ;;  %3496 = vmatmul.mubr.msk.bf16.gmra.mxu1 %vm344_vm2, %v3562_v18 }
  0x35   : > { %3483 = vmatprep.mubr.msk.bf16.mxu0 %vm344_vm2, %v3559_v19 }
  0x3c   : > { %3484 = vmatmul.mubr.msk.bf16.gmra.mxu0 %vm344_vm2, %v3560_v20 }
  0xe4   : > { %v3473_v27 = vpop.f32.mrf.mxu0  ;;  %v3489_v28 = vpop.f32.mrf.mxu1 }
  0xe5   : > { %v3750_v29 = vmax.f32 %v3473_v27, 0.0  ;;  %v3752_v30 = vmax.f32 %v3489_v28, 0.0 }
  0xe6   : > { %v428_v31 = vpop.f32.mrf.mxu0  ;;  %v492_v39 = vpop.f32.mrf.mxu1 }
  0xe7   : > { %5067 = vst [vmem:[#allocation6_spill] sm:$0xff] %v3752_v30  ;;  %v731_v32 = vcombine.high %v3750_v29, %v3750_v29  ;;  %v738_v33 = vrot.slane %v3750_v29, %v3748_v26  ;;  %v3758_v34 = vmax.f32 %v428_v31, 0.0  ;;  %v3762_v35 = vmul.f32 %v3750_v29, %v3750_v29 }
  0xe8   : > { %v3474_v36 = vpop.f32.mrf.mxu0  ;;  %v3766_v37 = vmul.f32 %v3752_v30, %v3752_v30  ;;  %v1003_v38 = vcombine.high %v3752_v30, %v3752_v30  ;;  %v3773_v42 = vrot.slane %v3752_v30, %v3748_v26  ;;  %v3775_v43 = vmax.f32 %v492_v39, 0.0 }
  0xe9   : > { %v745_v40 = vrot.slane %v731_v32, %v3748_v26  ;;  %v746_v41 = vcombine.high %v738_v33, %v738_v33  ;;  %v1295_v44 = vsel %vm387_vm0, %v738_v33, -inf  ;;  %v697_v45 = vcombine.high %v3758_v34, %v3758_v34 }
  0xea   : > { %5068 = vst [vmem:[#allocation7_spill] sm:$0xff] %v3766_v37  ;;  %5069 = vst [vmem:[#allocation8_spill] sm:$0xff] %v3775_v43  ;;  %v704_v46 = vrot.slane %v3758_v34, %v3748_v26  ;;  %v3782_v47 = vmax.f32 %v3474_v36, 0.0  ;;  %v2176_v50 = vsel %vm387_vm0, %v738_v33, inf  ;;  %v3790_v51 = vmul.f32 %v3758_v34, %v3758_v34 }
  0xeb   : > { %v3784_v48 = vcombine.high %v745_v40, %v745_v40  ;;  %v1304_v49 = vsel %vm387_vm0, %v746_v41, -inf  ;;  %v1313_v52 = vsel %vm387_vm0, %v745_v40, -inf  ;;  %v2185_v53 = vsel %vm387_vm0, %v746_v41, inf }
  0xec   : > { %v711_v54 = vrot.slane %v697_v45, %v3748_v26  ;;  %v712_v55 = vcombine.high %v704_v46, %v704_v46  ;;  %v2194_v56 = vsel %vm387_vm0, %v745_v40, inf  ;;  %v3797_v57 = vsel %vm387_vm0, %v704_v46, -inf }
  0xed   : > { %v748_v58 = vcombine.high %v3782_v47, %v3782_v47  ;;  %v755_v59 = vrot.slane %v3782_v47, %v3748_v26  ;;  %v3811_v12 = vsel %vm387_vm0, %v704_v46, inf  ;;  %v3815_v22 = vmul.f32 %v3782_v47, %v3782_v47 }
  0xee   : > { %v713_v60 = vcombine.high %v711_v54, %v711_v54  ;;  %v1294_v61 = vsel %vm387_vm0, %v712_v55, -inf  ;;  %v1303_v62 = vsel %vm387_vm0, %v711_v54, -inf  ;;  %v2175_v63 = vsel %vm387_vm0, %v712_v55, inf }
  0xef   : > { %v1296_v0 = vmax.f32 %v1294_v61, %v1295_v44  ;;  %v1305_v1 = vmax.f32 %v1303_v62, %v1304_v49  ;;  %v2177_v2 = vmin.f32 %v2175_v63, %v2176_v50  ;;  %v2184_v3 = vsel %vm387_vm0, %v711_v54, inf }
  0xf0   : > { %v1312_v4 = vsel %vm387_vm0, %v713_v60, -inf  ;;  %v2186_v5 = vmin.f32 %v2184_v3, %v2185_v53  ;;  %v2193_v6 = vsel %vm387_vm0, %v713_v60, inf  ;;  %v762_v7 = vrot.slane %v748_v58, %v3748_v26 }
  0xf1   : > { %v1297_v8 = vrot.slane %v1296_v0, 4  ;;  %v1306_v9 = vrot.slane %v1305_v1, 4  ;;  %v1314_v10 = vmax.f32 %v1312_v4, %v1313_v52  ;;  %v2178_v11 = vrot.slane %v2177_v2, 4 }
  0xf2   : > { %v2187_v13 = vrot.slane %v2186_v5, 4  ;;  %v2195_v14 = vmin.f32 %v2193_v6, %v2194_v56  ;;  %v763_v15 = vcombine.high %v755_v59, %v755_v59  ;;  %v3817_v23 = vcombine.high %v762_v7, %v762_v7 }
  0xf3   : > { %v1298_v16 = vmax.f32 %v1296_v0, %v1297_v8  ;;  %v1307_v17 = vmax.f32 %v1305_v1, %v1306_v9  ;;  %v1315_v18 = vrot.slane %v1314_v10, 4  ;;  %v2179_v19 = vmin.f32 %v2177_v2, %v2178_v11  ;;  %v431_v11 = vpop.f32.mrf.mxu0 }
  0xf4   : > { %v2188_v20 = vmin.f32 %v2186_v5, %v2187_v13  ;;  %v2196_v21 = vrot.slane %v2195_v14, 4  ;;  %v3820_v36 = vsel %vm387_vm0, %v755_v59, -inf  ;;  %v3823_v39 = vsel %vm387_vm0, %v763_v15, -inf }
  0xf5   : > { %v1299_v25 = vrot.slane %v1298_v16, 2  ;;  %v1308_v27 = vrot.slane %v1307_v17, 2  ;;  %v1316_v28 = vmax.f32 %v1314_v10, %v1315_v18  ;;  %v2180_v31 = vrot.slane %v2179_v19, 2 }
  0xf6   : > { %v2189_v32 = vrot.slane %v2188_v20, 2  ;;  %v2197_v33 = vmin.f32 %v2195_v14, %v2196_v21  ;;  %v3826_v50 = vsel %vm387_vm0, %v762_v7, -inf  ;;  %v3829_v52 = vsel %vm387_vm0, %v755_v59, inf }
  0xf7   : > { %v1300_v40 = vmax.f32 %v1298_v16, %v1299_v25  ;;  %v1309_v41 = vmax.f32 %v1307_v17, %v1308_v27  ;;  %v1317_v44 = vrot.slane %v1316_v28, 2  ;;  %v2181_v45 = vmin.f32 %v2179_v19, %v2180_v31 }
  0xf8   : > { %v2190_v46 = vmin.f32 %v2188_v20, %v2189_v32  ;;  %v2198_v49 = vrot.slane %v2197_v33, 2  ;;  %v3832_v61 = vsel %vm387_vm0, %v763_v15, inf  ;;  %v1017_v62 = vrot.slane %v1003_v38, %v3748_v26 }
  0xf9   : > { %v1301_v53 = vrot.slane %v1300_v40, 1  ;;  %v1310_v54 = vrot.slane %v1309_v41, 1  ;;  %v1318_v55 = vmax.f32 %v1316_v28, %v1317_v44  ;;  %v2182_v56 = vrot.slane %v2181_v45, 1  ;;  %v3477_v44 = vpop.f32.mrf.mxu0 }
  0xfa   : > { %v2191_v58 = vrot.slane %v2190_v46, 1  ;;  %v2199_v60 = vmin.f32 %v2197_v33, %v2198_v49  ;;  %v3839_v4 = vsel %vm387_vm0, %v762_v7, inf  ;;  %v3843_v5 = vcombine.high %v3773_v42, %v3773_v42 }
  0xfb   : > { %v1302_v63 = vmax.f32 %v1300_v40, %v1301_v53  ;;  %v1311_v0 = vmax.f32 %v1309_v41, %v1310_v54  ;;  %v1319_v1 = vrot.slane %v1318_v55, 1  ;;  %v2183_v2 = vmin.f32 %v2181_v45, %v2182_v56 }
  0xfc   : > { %v2192_v59 = vmin.f32 %v2190_v46, %v2191_v58  ;;  %v2200_v3 = vrot.slane %v2199_v60, 1  ;;  %v3845_v14 = vcombine.high %v1017_v62, %v1017_v62  ;;  %v3849_v15 = vsel %vm387_vm0, %v3773_v42, -inf }
  0xfd   : > { %v1320_v6 = vmax.f32 %v1318_v55, %v1319_v1  ;;  %v3337_v8 = vpack.c.bf16 %v1302_v63, %v1302_v63  ;;  %v3338_v9 = vpack.c.bf16 %v1311_v0, %v1311_v0  ;;  %v3393_v10 = vpack.c.bf16 %v2183_v2, %v2183_v2 }
  0xfe   : > { %v2201_v13 = vmin.f32 %v2199_v60, %v2200_v3  ;;  %v3394_v38 = vpack.c.bf16 %v2192_v59, %v2192_v59  ;;  %v3854_v17 = vsel %vm387_vm0, %v1017_v62, -inf  ;;  %v3858_v18 = vsel %vm387_vm0, %v3773_v42, inf }
  0xff   : > { %v3339_v16 = vpack.c.bf16 %v1320_v6, %v1320_v6  ;;  %v3851_v7 = vunpack.c.l.b16 %v3337_v8  ;;  %v3860_v19 = vunpack.c.l.b16 %v3338_v9  ;;  %v3862_v21 = vunpack.c.l.b16 %v3393_v10 }
 0x100   : > { %v3395_v20 = vpack.c.bf16 %v2201_v13, %v2201_v13  ;;  %v540_v25 = vmax.f32 %v431_v11, 0.0  ;;  %v3866_v28 = vunpack.c.l.b16 %v3394_v38  ;;  %v3869_v31 = vsel %vm387_vm0, %v1017_v62, inf }
 0x101   : > { %v3864_v27 = vunpack.c.l.b16 %v3339_v16  ;;  %v1322_v32 = vsel %vm387_vm0, %v3784_v48, -inf  ;;  %v2203_v41 = vsel %vm387_vm0, %v3784_v48, inf  ;;  %v3881_v49 = vmul.f32 %v3775_v43, %v3775_v43 }
 0x102   : > { %v567_v33 = vadd.f32 %v540_v25, %v3758_v34  ;;  %v601_v42 = vmul.f32 %v540_v25, %v540_v25  ;;  %v714_v40 = vcombine.high %v540_v25, %v540_v25  ;;  %v3876_v45 = vunpack.c.l.b16 %v3395_v20 }
 0x103   : > { %v721_v46 = vrot.slane %v540_v25, %v3748_v26  ;;  %5070 = vst [vmem:[#allocation9_spill] sm:$0xff] %v3881_v49  ;;  %v969_v53 = vcombine.high %v3775_v43, %v3775_v43  ;;  %v3892_v48 = vrot.slane %v3775_v43, %v3748_v26  ;;  %v3896_v62 = vmax.f32 %v3477_v44, 0.0 }
 0x104   : > { %v3886_v54 = vadd.f32 %v567_v33, %v3750_v29  ;;  %v628_v34 = vadd.f32 %v601_v42, %v3790_v51  ;;  %v728_v55 = vrot.slane %v714_v40, %v3748_v26 }
 0x105   : > { %v729_v56 = vcombine.high %v721_v46, %v721_v46  ;;  %v1321_v58 = vsel %vm387_vm0, %v721_v46, -inf  ;;  %v2202_v60 = vsel %vm387_vm0, %v721_v46, inf }
 0x106   : > { %v3899_v63 = vadd.f32 %v628_v34, %v3762_v35  ;;  %v730_v29 = vcombine.high %v728_v55, %v728_v55  ;;  %v1323_v0 = vmax.f32 %v1321_v58, %v1322_v32  ;;  %v1339_v51 = vsel %vm387_vm0, %v728_v55, -inf }
 0x107   : > { %v1330_v1 = vsel %vm387_vm0, %v729_v56, -inf  ;;  %v1341_v2 = vmax.f32 %v1339_v51, %v3823_v39  ;;  %v2204_v59 = vmin.f32 %v2202_v60, %v2203_v41  ;;  %v2211_v3 = vsel %vm387_vm0, %v729_v56, inf }
 0x108   : > { %v1286_v6 = vsel %vm387_vm0, %v730_v29, -inf  ;;  %v1324_v8 = vrot.slane %v1323_v0, 4  ;;  %v1332_v9 = vmax.f32 %v1330_v1, %v3820_v36  ;;  %v2167_v10 = vsel %vm387_vm0, %v730_v29, inf }
 0x109   : > { %v1287_v35 = vmax.f32 %v3797_v57, %v1286_v6  ;;  %v1342_v11 = vrot.slane %v1341_v2, 4  ;;  %v2168_v13 = vmin.f32 %v3811_v12, %v2167_v10  ;;  %v2205_v38 = vrot.slane %v2204_v59, 4 }
 0x10a   : > { %v1325_v16 = vmax.f32 %v1323_v0, %v1324_v8  ;;  %v1333_v20 = vrot.slane %v1332_v9, 4  ;;  %v2213_v39 = vmin.f32 %v2211_v3, %v3829_v52  ;;  %v2220_v25 = vsel %vm387_vm0, %v728_v55, inf }
 0x10b   : > { %v1288_v32 = vrot.slane %v1287_v35, 4  ;;  %v1343_v33 = vmax.f32 %v1341_v2, %v1342_v11  ;;  %v2169_v42 = vrot.slane %v2168_v13, 4  ;;  %v2206_v40 = vmin.f32 %v2204_v59, %v2205_v38 }
 0x10c   : > { %v1326_v36 = vrot.slane %v1325_v16, 2  ;;  %v1334_v41 = vmax.f32 %v1332_v9, %v1333_v20  ;;  %v2214_v44 = vrot.slane %v2213_v39, 4  ;;  %v2222_v57 = vmin.f32 %v2220_v25, %v3832_v61 }
 0x10d   : > { %v1289_v46 = vmax.f32 %v1287_v35, %v1288_v32  ;;  %v1344_v34 = vrot.slane %v1343_v33, 2  ;;  %v2170_v12 = vmin.f32 %v2168_v13, %v2169_v42  ;;  %v2207_v56 = vrot.slane %v2206_v40, 2 }
 0x10e   : > { %v1327_v58 = vmax.f32 %v1325_v16, %v1326_v36  ;;  %v1335_v60 = vrot.slane %v1334_v41, 2  ;;  %v2215_v29 = vmin.f32 %v2213_v39, %v2214_v44  ;;  %v2223_v52 = vrot.slane %v2222_v57, 4 }
 0x10f   : > { %v1290_v55 = vrot.slane %v1289_v46, 2  ;;  %v1345_v0 = vmax.f32 %v1343_v33, %v1344_v34  ;;  %v2171_v51 = vrot.slane %v2170_v12, 2  ;;  %v2208_v1 = vmin.f32 %v2206_v40, %v2207_v56 }
 0x110   : > { %v1328_v2 = vrot.slane %v1327_v58, 1  ;;  %v1336_v59 = vmax.f32 %v1334_v41, %v1335_v60  ;;  %v2216_v3 = vrot.slane %v2215_v29, 2  ;;  %v2224_v6 = vmin.f32 %v2222_v57, %v2223_v52 }
 0x111   : > { %v1291_v61 = vmax.f32 %v1289_v46, %v1290_v55  ;;  %v1346_v8 = vrot.slane %v1345_v0, 1  ;;  %v2172_v9 = vmin.f32 %v2170_v12, %v2171_v51  ;;  %v2209_v10 = vrot.slane %v2208_v1, 1 }
 0x112   : > { %v1329_v35 = vmax.f32 %v1327_v58, %v1328_v2  ;;  %v1337_v11 = vrot.slane %v1336_v59, 1  ;;  %v2217_v13 = vmin.f32 %v2215_v29, %v2216_v3  ;;  %v2225_v38 = vrot.slane %v2224_v6, 2  ;;  %v3490_v58 = vpop.f32.mrf.mxu1 }
 0x113   : > { %v1292_v16 = vrot.slane %v1291_v61, 1  ;;  %v1347_v20 = vmax.f32 %v1345_v0, %v1346_v8  ;;  %v2173_v39 = vrot.slane %v2172_v9, 1  ;;  %v2210_v25 = vmin.f32 %v2208_v1, %v2209_v10 }
 0x114   : > { %v1338_v32 = vmax.f32 %v1336_v59, %v1337_v11  ;;  %v3340_v33 = vpack.c.bf16 %v1329_v35, %v1329_v35  ;;  %v2218_v42 = vrot.slane %v2217_v13, 1  ;;  %v2226_v40 = vmin.f32 %v2224_v6, %v2225_v38 }
 0x115   : > { %v1293_v36 = vmax.f32 %v1291_v61, %v1292_v16  ;;  %v3342_v41 = vpack.c.bf16 %v1347_v20, %v1347_v20  ;;  %v2174_v44 = vmin.f32 %v2172_v9, %v2173_v39  ;;  %v3396_v57 = vpack.c.bf16 %v2210_v25, %v2210_v25 }
 0x116   : > { %v3341_v46 = vpack.c.bf16 %v1338_v32, %v1338_v32  ;;  %v2219_v34 = vmin.f32 %v2217_v13, %v2218_v42  ;;  %v2227_v12 = vrot.slane %v2226_v40, 1  ;;  %v983_v56 = vrot.slane %v969_v53, %v3748_v26 }
 0x117   : > { %v3336_v60 = vpack.c.bf16 %v1293_v36, %v1293_v36  ;;  %v2017_v29 = vunpack.c.l.b16 %v3340_v33  ;;  %v3392_v52 = vpack.c.bf16 %v2174_v44, %v2174_v44  ;;  %v3930_v55 = vmax.f32 %v3490_v58, 0.0 }
 0x118   : > { %v2019_v0 = vunpack.c.l.b16 %v3342_v41  ;;  %v2228_v51 = vmin.f32 %v2226_v40, %v2227_v12  ;;  %v3397_v1 = vpack.c.bf16 %v2219_v34, %v2219_v34  ;;  %v984_v2 = vcombine.high %v3892_v48, %v3892_v48  ;;  %v3014_v34 = vld [vmem:[%s3970_s29] sm:$0xf] }
 0x119   : > { %5072 = vst [vmem:[#allocation10_spill] sm:$0xff] %v3930_v55  ;;  %v2013_v59 = vunpack.c.l.b16 %v3336_v60  ;;  %v2018_v3 = vunpack.c.l.b16 %v3341_v46  ;;  %v2894_v6 = vunpack.c.l.b16 %v3392_v52  ;;  %v2898_v61 = vunpack.c.l.b16 %v3396_v57  ;;  %v2142_v57 = vld [vmem:[%s3965_s23] sm:$0xf] }
 0x11a   : > { %v3398_v8 = vpack.c.bf16 %v2228_v51, %v2228_v51  ;;  %v2899_v9 = vunpack.c.l.b16 %v3397_v1  ;;  %v3935_v53 = vcombine.high %v983_v56, %v983_v56  ;;  %v3939_v10 = vsel %vm387_vm0, %v3892_v48, -inf }
 0x11b   : > { %5074 = vst [vmem:[#allocation12_spill] sm:$0xff] %v3939_v10  ;;  %v2070_v35 = vsel %vm2069_vm3, %v3851_v7, %v2013_v59  ;;  %v2950_v11 = vsel %vm2069_vm3, %v3862_v21, %v2894_v6  ;;  %v3946_v13 = vsel %vm387_vm0, %v984_v2, -inf  ;;  %v3949_v38 = vsel %vm387_vm0, %v983_v56, -inf }
 0x11c   : > { %5073 = vst [vmem:[#allocation11_spill] sm:$0xff] %v3935_v53  ;;  %5075 = vst [vmem:[#allocation13_spill] sm:$0xff] %v3949_v38  ;;  %v2072_v16 = vsel %vm2071_vm4, %v3860_v19, %v2070_v35  ;;  %v2951_v20 = vsel %vm2071_vm4, %v3866_v28, %v2950_v11  ;;  %v3957_v39 = vsel %vm387_vm0, %v3892_v48, inf  ;;  %v3960_v7 = vsel %vm387_vm0, %v984_v2, inf }
 0x11d   : > { %5076 = vst [vmem:[#allocation14_spill] sm:$0xff] %v3957_v39  ;;  %5077 = vst [vmem:[#allocation15_spill] sm:$0xff] %v3960_v7  ;;  %v2074_v19 = vsel %vm2073_vm5, %v3864_v27, %v2072_v16  ;;  %v2900_v21 = vunpack.c.l.b16 %v3398_v8  ;;  %v2952_v28 = vsel %vm2073_vm5, %v3876_v45, %v2951_v20  ;;  %v799_v48 = vcombine.high %v3896_v62, %v3896_v62 }
 0x11e   : > { %v2076_v25 = vsel %vm2075_vm6, %v2017_v29, %v2074_v19  ;;  %v2953_v32 = vsel %vm2075_vm6, %v2898_v61, %v2952_v28  ;;  %v3981_v33 = vsel %vm387_vm0, %v983_v56, inf  ;;  %v806_v42 = vrot.slane %v3896_v62, %v3748_v26 }
 0x11f   : > { %5078 = vst [vmem:[#allocation16_spill] sm:$0xff] %v3981_v33  ;;  %v2078_v27 = vsel %vm2077_vm7, %v2018_v3, %v2076_v25  ;;  %v2954_v40 = vsel %vm2077_vm7, %v2899_v9, %v2953_v32  ;;  %v813_v36 = vrot.slane %v799_v48, %v3748_v26  ;;  %v1020_v45 = vcombine.high %v3930_v55, %v3930_v55  ;;  %v495_v3 = vpop.f32.mrf.mxu1 }
 0x120   : > { %v2080_v41 = vsel %vm2079_vm8, %v2019_v0, %v2078_v27  ;;  %v2955_v46 = vsel %vm2079_vm8, %v2900_v21, %v2954_v40  ;;  %v4002_v12 = vmul.f32 %v3896_v62, %v3896_v62  ;;  %v814_v56 = vcombine.high %v806_v42, %v806_v42  ;;  %v444_v0 = vpop.f32.mrf.mxu0 }
 0x121   : > { %v2123_v58 = vpack.c.b16 %v2080_v41, %v2080_v41  ;;  %v2998_v60 = vpack.c.b16 %v2955_v46, %v2955_v46  ;;  %v1376_v29 = vsel %vm387_vm0, %v806_v42, -inf  ;;  %v4007_v52 = vmul.f32 %v3930_v55, %v3930_v55 }
 0x122   : > { %v4009_v51 = vcombine.high %v813_v36, %v813_v36  ;;  %v1385_v1 = vsel %vm387_vm0, %v814_v56, -inf  ;;  %v1394_v2 = vsel %vm387_vm0, %v813_v36, -inf  ;;  %v2257_v59 = vsel %vm387_vm0, %v806_v42, inf }
 0x123   : > { %5081 = vst [vmem:[#allocation17_spill] sm:$0xff] %v4007_v52  ;;  %v2143_v6 = vsel %vm3993_vm11, %v2123_v58, %v2142_v57  ;;  %v3015_v61 = vsel %vm3993_vm11, %v2998_v60, %v3014_v34  ;;  %v1027_v8 = vrot.slane %v3930_v55, %v3748_v26  ;;  %v1034_v9 = vrot.slane %v1020_v45, %v3748_v26  ;;  %v3478_v57 = vpop.f32.mrf.mxu0 }
 0x124   : > { %2144 = vst [vmem:[%s3965_s23] sm:$0xf] %v2143_v6  ;;  %3016 = vst [vmem:[%s3970_s29] sm:$0xf] %v3015_v61  ;;  %v2266_v35 = vsel %vm387_vm0, %v814_v56, inf  ;;  %v543_v11 = vmax.f32 %v444_v0, 0.0  ;;  %v569_v16 = vadd.f32 %v3886_v54, %v3782_v47  ;;  %v630_v20 = vadd.f32 %v3899_v63, %v3815_v22 }
 0x125   : > { %v2275_v19 = vsel %vm387_vm0, %v813_v36, inf  ;;  %v1035_v21 = vcombine.high %v1027_v8, %v1027_v8  ;;  %v1036_v28 = vcombine.high %v1034_v9, %v1034_v9  ;;  %v4029_v48 = vmax.f32 %v495_v3, 0.0 }
 0x126   : > { %v4032_v25 = vsel %vm387_vm0, %v1034_v9, -inf  ;;  %v4035_v32 = vsel %vm387_vm0, %v1027_v8, -inf  ;;  %v4037_v42 = vadd.f32 %v569_v16, %v543_v11  ;;  %v604_v27 = vmul.f32 %v543_v11, %v543_v11 }
 0x127   : > { %5082 = vst [vmem:[#allocation18_spill] sm:$0xff] %v4029_v48  ;;  %v1619_v47 = vsel %vm387_vm0, %v1036_v28, -inf  ;;  %v4041_v54 = vsel %vm387_vm0, %v1034_v9, inf  ;;  %v2500_v22 = vsel %vm387_vm0, %v1036_v28, inf  ;;  %v4045_v63 = vsel %vm387_vm0, %v1027_v8, inf }
 0x128   : > { %v1620_v40 = vmax.f32 %v3849_v15, %v1619_v47  ;;  %v2501_v36 = vmin.f32 %v3858_v18, %v2500_v22  ;;  %v4049_v45 = vadd.f32 %v630_v20, %v604_v27  ;;  %v765_v41 = vcombine.high %v543_v11, %v543_v11 }
 0x129   : > { %v4052_v46 = vsel %vm387_vm0, %v1035_v21, -inf  ;;  %v4055_v34 = vsel %vm387_vm0, %v1035_v21, inf  ;;  %v772_v56 = vrot.slane %v543_v11, %v3748_v26  ;;  %v4060_v58 = vmul.f32 %v4029_v48, %v4029_v48 }
 0x12a   : > { %v1621_v60 = vrot.slane %v1620_v40, 4  ;;  %v2502_v15 = vrot.slane %v2501_v36, 4  ;;  %v779_v18 = vrot.slane %v765_v41, %v3748_v26  ;;  %v986_v0 = vcombine.high %v4029_v48, %v4029_v48 }
 0x12b   : > { %5083 = vst [vmem:[#allocation19_spill] sm:$0xff] %v4060_v58  ;;  %v780_v3 = vcombine.high %v772_v56, %v772_v56  ;;  %v4066_v6 = vsel %vm387_vm0, %v772_v56, -inf  ;;  %v4070_v61 = vrot.slane %v4029_v48, %v3748_v26  ;;  %v4072_v8 = vmax.f32 %v3478_v57, 0.0 }
 0x12c   : > { %v1622_v9 = vmax.f32 %v1620_v40, %v1621_v60  ;;  %v2503_v11 = vmin.f32 %v2501_v36, %v2502_v15  ;;  %v781_v16 = vcombine.high %v779_v18, %v779_v18  ;;  %v1384_v20 = vsel %vm387_vm0, %v779_v18, -inf }
 0x12d   : > { %v1375_v21 = vsel %vm387_vm0, %v780_v3, -inf  ;;  %v1386_v28 = vmax.f32 %v1384_v20, %v1385_v1  ;;  %v2256_v27 = vsel %vm387_vm0, %v780_v3, inf  ;;  %v2265_v47 = vsel %vm387_vm0, %v779_v18, inf }
 0x12e   : > { %v1623_v22 = vrot.slane %v1622_v9, 2  ;;  %v2504_v41 = vrot.slane %v2503_v11, 2  ;;  %v1377_v24 = vmax.f32 %v1375_v21, %v1376_v29  ;;  %v1393_v52 = vsel %vm387_vm0, %v781_v16, -inf }
 0x12f   : > { %v1387_v55 = vrot.slane %v1386_v28, 4  ;;  %v1395_v57 = vmax.f32 %v1393_v52, %v1394_v2  ;;  %v2258_v37 = vmin.f32 %v2256_v27, %v2257_v59  ;;  %v2267_v40 = vmin.f32 %v2265_v47, %v2266_v35 }
 0x130   : > { %v1624_v36 = vmax.f32 %v1622_v9, %v1623_v22  ;;  %v2505_v60 = vmin.f32 %v2503_v11, %v2504_v41  ;;  %v1378_v15 = vrot.slane %v1377_v24, 4  ;;  %v2274_v30 = vsel %vm387_vm0, %v781_v16, inf }
 0x131   : > { %v1388_v58 = vmax.f32 %v1386_v28, %v1387_v55  ;;  %v1396_v1 = vrot.slane %v1395_v57, 4  ;;  %v2259_v20 = vrot.slane %v2258_v37, 4  ;;  %v2268_v3 = vrot.slane %v2267_v40, 4 }
 0x132   : > { %v1625_v49 = vrot.slane %v1624_v36, 1  ;;  %v2506_v18 = vrot.slane %v2505_v60, 1  ;;  %v1379_v48 = vmax.f32 %v1377_v24, %v1378_v15  ;;  %v2276_v43 = vmin.f32 %v2274_v30, %v2275_v19 }
 0x133   : > { %v1389_v29 = vrot.slane %v1388_v58, 2  ;;  %v1397_v21 = vmax.f32 %v1395_v57, %v1396_v1  ;;  %v2260_v53 = vmin.f32 %v2258_v37, %v2259_v20  ;;  %v2269_v33 = vmin.f32 %v2267_v40, %v2268_v3 }
 0x134   : > { %v1626_v52 = vmax.f32 %v1624_v36, %v1625_v49  ;;  %v2507_v2 = vmin.f32 %v2505_v60, %v2506_v18  ;;  %v1380_v59 = vrot.slane %v1379_v48, 2  ;;  %v2277_v35 = vrot.slane %v2276_v43, 4 }
 0x135   : > { %v1390_v9 = vmax.f32 %v1388_v58, %v1389_v29  ;;  %v1398_v11 = vrot.slane %v1397_v21, 2  ;;  %v2261_v27 = vrot.slane %v2260_v53, 2  ;;  %v2270_v16 = vrot.slane %v2269_v33, 2 }
 0x136   : > { %v1381_v55 = vmax.f32 %v1379_v48, %v1380_v59  ;;  %v4081_v28 = vsel %vm387_vm0, %v772_v56, inf  ;;  %v2278_v47 = vmin.f32 %v2276_v43, %v2277_v35  ;;  %v1000_v24 = vrot.slane %v986_v0, %v3748_v26 }
 0x137   : > { %v1391_v30 = vrot.slane %v1390_v9, 1  ;;  %v1399_v19 = vmax.f32 %v1397_v21, %v1398_v11  ;;  %v2262_v22 = vmin.f32 %v2260_v53, %v2261_v27  ;;  %v2271_v37 = vmin.f32 %v2269_v33, %v2270_v16 }
 0x138   : > { %v3373_v41 = vpack.c.bf16 %v1626_v52, %v1626_v52  ;;  %v3429_v49 = vpack.c.bf16 %v2507_v2, %v2507_v2  ;;  %v1382_v57 = vrot.slane %v1381_v55, 1  ;;  %v2279_v40 = vrot.slane %v2278_v47, 2 }
 0x139   : > { %v1392_v36 = vmax.f32 %v1390_v9, %v1391_v30  ;;  %v1400_v58 = vrot.slane %v1399_v19, 1  ;;  %v2263_v60 = vrot.slane %v2262_v22, 1  ;;  %v2272_v15 = vrot.slane %v2271_v37, 1 }
 0x13a   : > { %v1383_v1 = vmax.f32 %v1381_v55, %v1382_v57  ;;  %v2280_v48 = vmin.f32 %v2278_v47, %v2279_v40  ;;  %v1001_v56 = vcombine.high %v4070_v61, %v4070_v61  ;;  %v1002_v43 = vcombine.high %v1000_v24, %v1000_v24 }
 0x13b   : > { %v1401_v20 = vmax.f32 %v1399_v19, %v1400_v58  ;;  %v3347_v0 = vpack.c.bf16 %v1392_v36, %v1392_v36  ;;  %v2264_v3 = vmin.f32 %v2262_v22, %v2263_v60  ;;  %v2273_v18 = vmin.f32 %v2271_v37, %v2272_v15  ;;  %v447_v60 = vpop.f32.mrf.mxu0 }
 0x13c   : > { %v4086_v53 = vunpack.c.l.b16 %v3373_v41  ;;  %v4088_v33 = vunpack.c.l.b16 %v3429_v49  ;;  %v3346_v29 = vpack.c.bf16 %v1383_v1, %v1383_v1  ;;  %v2281_v21 = vrot.slane %v2280_v48, 1 }
 0x13d   : > { %v3348_v52 = vpack.c.bf16 %v1401_v20, %v1401_v20  ;;  %v3402_v2 = vpack.c.bf16 %v2264_v3, %v2264_v3  ;;  %v3403_v59 = vpack.c.bf16 %v2273_v18, %v2273_v18  ;;  %v4092_v35 = vsel %vm387_vm0, %v4070_v61, -inf }
 0x13e   : > { %5084 = vst [vmem:[#allocation20_spill] sm:$0xff] %v4092_v35  ;;  %v2282_v9 = vmin.f32 %v2280_v48, %v2281_v21  ;;  %v4095_v11 = vsel %vm387_vm0, %v1001_v56, -inf  ;;  %v1600_v27 = vsel %vm387_vm0, %v1000_v24, -inf  ;;  %v1609_v16 = vsel %vm387_vm0, %v1002_v43, -inf }
 0x13f   : > { %5085 = vst [vmem:[#allocation21_spill] sm:$0xff] %v4095_v11  ;;  %v4099_v55 = vunpack.c.l.b16 %v3346_v29  ;;  %v4101_v47 = vunpack.c.l.b16 %v3347_v0  ;;  %v4103_v30 = vunpack.c.l.b16 %v3348_v52  ;;  %v1602_v19 = vmax.f32 %v1600_v27, %v4052_v46 }
 0x140   : > { %v3404_v22 = vpack.c.bf16 %v2282_v9, %v2282_v9  ;;  %v4106_v37 = vunpack.c.l.b16 %v3402_v2  ;;  %v4108_v41 = vunpack.c.l.b16 %v3403_v59  ;;  %v1611_v49 = vmax.f32 %v1609_v16, %v4032_v25 }
 0x141   : > { %v1603_v57 = vrot.slane %v1602_v19, 4  ;;  %v4113_v40 = vsel %vm387_vm0, %v4070_v61, inf  ;;  %v2481_v36 = vsel %vm387_vm0, %v1000_v24, inf  ;;  %v2490_v58 = vsel %vm387_vm0, %v1002_v43, inf }
 0x142   : > { %5086 = vst [vmem:[#allocation22_spill] sm:$0xff] %v4113_v40  ;;  %v1612_v15 = vrot.slane %v1611_v49, 4  ;;  %v4118_v46 = vsel %vm387_vm0, %v1001_v56, inf  ;;  %v2483_v1 = vmin.f32 %v2481_v36, %v4055_v34  ;;  %v2492_v48 = vmin.f32 %v2490_v58, %v4041_v54 }
 0x143   : > { %5087 = vst [vmem:[#allocation23_spill] sm:$0xff] %v4118_v46  ;;  %v1604_v20 = vmax.f32 %v1602_v19, %v1603_v57  ;;  %v4124_v25 = vmul.f32 %v4072_v8, %v4072_v8  ;;  %v816_v61 = vcombine.high %v4072_v8, %v4072_v8  ;;  %v823_v24 = vrot.slane %v4072_v8, %v3748_v26 }
 0x144   : > { %v1613_v43 = vmax.f32 %v1611_v49, %v1612_v15  ;;  %v2484_v0 = vrot.slane %v2483_v1, 4  ;;  %v2493_v3 = vrot.slane %v2492_v48, 4  ;;  %v544_v56 = vmax.f32 %v447_v60, 0.0 }
 0x145   : > { %v4130_v18 = vunpack.c.l.b16 %v3404_v22  ;;  %v1605_v34 = vrot.slane %v1604_v20, 2  ;;  %v830_v54 = vrot.slane %v816_v61, %v3748_v26  ;;  %v1357_v29 = vsel %vm387_vm0, %v3817_v23, -inf }
 0x146   : > { %v1614_v21 = vrot.slane %v1613_v43, 2  ;;  %v2485_v52 = vmin.f32 %v2483_v1, %v2484_v0  ;;  %v2494_v2 = vmin.f32 %v2492_v48, %v2493_v3  ;;  %v4135_v59 = vcombine.high %v823_v24, %v823_v24 }
 0x147   : > { %v1606_v9 = vmax.f32 %v1604_v20, %v1605_v34  ;;  %v4137_v27 = vcombine.high %v830_v54, %v830_v54  ;;  %v4140_v16 = vsel %vm387_vm0, %v823_v24, -inf  ;;  %v4143_v19 = vsel %vm387_vm0, %v823_v24, inf }
 0x148   : > { %v1615_v22 = vmax.f32 %v1613_v43, %v1614_v21  ;;  %v2486_v49 = vrot.slane %v2485_v52, 2  ;;  %v2495_v57 = vrot.slane %v2494_v2, 2  ;;  %v571_v36 = vadd.f32 %v4037_v42, %v544_v56 }
 0x149   : > { %v1607_v58 = vrot.slane %v1606_v9, 1  ;;  %v605_v60 = vmul.f32 %v544_v56, %v544_v56  ;;  %v782_v15 = vcombine.high %v544_v56, %v544_v56  ;;  %v789_v1 = vrot.slane %v544_v56, %v3748_v26 }
 0x14a   : > { %v1616_v48 = vrot.slane %v1615_v22, 1  ;;  %v2487_v20 = vmin.f32 %v2485_v52, %v2486_v49  ;;  %v2496_v61 = vmin.f32 %v2494_v2, %v2495_v57  ;;  %v4148_v0 = vadd.f32 %v571_v36, %v3896_v62 }
 0x14b   : > { %v1608_v3 = vmax.f32 %v1606_v9, %v1607_v58  ;;  %v632_v24 = vadd.f32 %v4049_v45, %v605_v60  ;;  %v796_v43 = vrot.slane %v782_v15, %v3748_v26  ;;  %v797_v34 = vcombine.high %v789_v1, %v789_v1 }
 0x14c   : > { %v1617_v21 = vmax.f32 %v1615_v22, %v1616_v48  ;;  %v2488_v46 = vrot.slane %v2487_v20, 1  ;;  %v2497_v42 = vrot.slane %v2496_v61, 1  ;;  %v1402_v40 = vsel %vm387_vm0, %v789_v1, -inf }
 0x14d   : > { %v3371_v11 = vpack.c.bf16 %v1608_v3, %v1608_v3  ;;  %v4154_v56 = vadd.f32 %v632_v24, %v4002_v12  ;;  %v798_v52 = vcombine.high %v796_v43, %v796_v43  ;;  %v1349_v2 = vsel %vm387_vm0, %v797_v34, -inf }
 0x14e   : > { %v3372_v62 = vpack.c.bf16 %v1617_v21, %v1617_v21  ;;  %v2489_v49 = vmin.f32 %v2487_v20, %v2488_v46  ;;  %v2498_v9 = vmin.f32 %v2496_v61, %v2497_v42  ;;  %v1350_v45 = vmax.f32 %v3826_v50, %v1349_v2 }
 0x14f   : > { %v2048_v57 = vunpack.c.l.b16 %v3371_v11  ;;  %v4159_v36 = vsel %vm387_vm0, %v830_v54, -inf  ;;  %v1358_v22 = vsel %vm387_vm0, %v796_v43, -inf  ;;  %v1367_v58 = vsel %vm387_vm0, %v798_v52, -inf }
 0x150   : > { %v2049_v60 = vunpack.c.l.b16 %v3372_v62  ;;  %v3427_v15 = vpack.c.bf16 %v2489_v49, %v2489_v49  ;;  %v1351_v12 = vrot.slane %v1350_v45, 4  ;;  %v1403_v48 = vsel %vm387_vm0, %v4009_v51, -inf }
 0x151   : > { %v1359_v3 = vmax.f32 %v1357_v29, %v1358_v22  ;;  %v1368_v46 = vmax.f32 %v4066_v6, %v1367_v58  ;;  %v1404_v20 = vmax.f32 %v1402_v40, %v1403_v48  ;;  %v2230_v50 = vsel %vm387_vm0, %v797_v34, inf }
 0x152   : > { %v4168_v11 = vsel %vm2069_vm3, %v2049_v60, %v2048_v57  ;;  %v3428_v61 = vpack.c.bf16 %v2498_v9, %v2498_v9  ;;  %v4171_v24 = vsel %vm387_vm0, %v830_v54, inf  ;;  %v1352_v21 = vmax.f32 %v1350_v45, %v1351_v12 }
 0x153   : > { %v1360_v42 = vrot.slane %v1359_v3, 4  ;;  %v1369_v2 = vrot.slane %v1368_v46, 4  ;;  %v1405_v62 = vrot.slane %v1404_v20, 4  ;;  %v2231_v49 = vmin.f32 %v3839_v4, %v2230_v50 }
 0x154   : > { %v2929_v35 = vunpack.c.l.b16 %v3427_v15  ;;  %v1353_v29 = vrot.slane %v1352_v21, 2  ;;  %v2238_v6 = vsel %vm387_vm0, %v3817_v23, inf  ;;  %v2239_v40 = vsel %vm387_vm0, %v796_v43, inf }
 0x155   : > { %v1361_v34 = vmax.f32 %v1359_v3, %v1360_v42  ;;  %v1370_v57 = vmax.f32 %v1368_v46, %v1369_v2  ;;  %v1406_v22 = vmax.f32 %v1404_v20, %v1405_v62  ;;  %v2232_v9 = vrot.slane %v2231_v49, 4 }
 0x156   : > { %v1354_v58 = vmax.f32 %v1352_v21, %v1353_v29  ;;  %v2240_v54 = vmin.f32 %v2238_v6, %v2239_v40  ;;  %v2248_v45 = vsel %vm387_vm0, %v798_v52, inf  ;;  %v2283_v60 = vsel %vm387_vm0, %v789_v1, inf }
 0x157   : > { %v1362_v12 = vrot.slane %v1361_v34, 2  ;;  %v1371_v48 = vrot.slane %v1370_v57, 2  ;;  %v1407_v4 = vrot.slane %v1406_v22, 2  ;;  %v2233_v15 = vmin.f32 %v2231_v49, %v2232_v9 }
 0x158   : > { %v1355_v50 = vrot.slane %v1354_v58, 1  ;;  %v2241_v7 = vrot.slane %v2240_v54, 4  ;;  %v2249_v23 = vmin.f32 %v4081_v28, %v2248_v45  ;;  %v2284_v43 = vsel %vm387_vm0, %v4009_v51, inf }
 0x159   : > { %v1363_v3 = vmax.f32 %v1361_v34, %v1362_v12  ;;  %v1372_v46 = vmax.f32 %v1370_v57, %v1371_v48  ;;  %v1408_v20 = vmax.f32 %v1406_v22, %v1407_v4  ;;  %v2234_v21 = vrot.slane %v2233_v15, 2  ;;  %v3493_v48 = vpop.f32.mrf.mxu1 }
 0x15a   : > { %v1356_v42 = vmax.f32 %v1354_v58, %v1355_v50  ;;  %v2242_v2 = vmin.f32 %v2240_v54, %v2241_v7  ;;  %v2250_v52 = vrot.slane %v2249_v23, 4  ;;  %v2285_v62 = vmin.f32 %v2283_v60, %v2284_v43 }
 0x15b   : > { %v1364_v1 = vrot.slane %v1363_v3, 1  ;;  %v1373_v29 = vrot.slane %v1372_v46, 1  ;;  %v1409_v6 = vrot.slane %v1408_v20, 1  ;;  %v2235_v40 = vmin.f32 %v2233_v15, %v2234_v21 }
 0x15c   : > { %v3343_v49 = vpack.c.bf16 %v1356_v42, %v1356_v42  ;;  %v2243_v9 = vrot.slane %v2242_v2, 2  ;;  %v2251_v38 = vmin.f32 %v2249_v23, %v2250_v52  ;;  %v2286_v39 = vrot.slane %v2285_v62, 4 }
 0x15d   : > { %v1365_v28 = vmax.f32 %v1363_v3, %v1364_v1  ;;  %v1374_v45 = vmax.f32 %v1372_v46, %v1373_v29  ;;  %v1410_v10 = vmax.f32 %v1408_v20, %v1409_v6  ;;  %v2236_v51 = vrot.slane %v2235_v40, 1 }
 0x15e   : > { %v2930_v34 = vunpack.c.l.b16 %v3428_v61  ;;  %v2244_v57 = vmin.f32 %v2242_v2, %v2243_v9  ;;  %v2252_v22 = vrot.slane %v2251_v38, 2  ;;  %v2287_v12 = vmin.f32 %v2285_v62, %v2286_v39 }
 0x15f   : > { %v3344_v58 = vpack.c.bf16 %v1365_v28, %v1365_v28  ;;  %v3345_v7 = vpack.c.bf16 %v1374_v45, %v1374_v45  ;;  %v2020_v54 = vunpack.c.l.b16 %v3343_v49  ;;  %v2237_v60 = vmin.f32 %v2235_v40, %v2236_v51 }
 0x160   : > { %v2245_v4 = vrot.slane %v2244_v57, 1  ;;  %v2253_v50 = vmin.f32 %v2251_v38, %v2252_v22  ;;  %v2288_v15 = vrot.slane %v2287_v12, 2  ;;  %v4182_v43 = vmax.f32 %v3493_v48, 0.0  ;;  %v508_v22 = vpop.f32.mrf.mxu1 }
 0x161   : > { %v3349_v23 = vpack.c.bf16 %v1410_v10, %v1410_v10  ;;  %v2021_v21 = vunpack.c.l.b16 %v3344_v58  ;;  %v2022_v3 = vunpack.c.l.b16 %v3345_v7  ;;  %v3399_v46 = vpack.c.bf16 %v2237_v60, %v2237_v60  ;;  %v2145_v60 = vld [vmem:[%s3965_s23 + $0x4] sm:$0xf] }
 0x162   : > { %5088 = vst [vmem:[#allocation24_spill] sm:$0xff] %v4182_v43  ;;  %v4185_v20 = vsel %vm2069_vm3, %v2930_v34, %v2929_v35  ;;  %v2246_v61 = vmin.f32 %v2244_v57, %v2245_v4  ;;  %v2254_v42 = vrot.slane %v2253_v50, 1  ;;  %v2289_v39 = vmin.f32 %v2287_v12, %v2288_v15  ;;  %v3481_v57 = vpop.f32.mrf.mxu0 }
 0x163   : > { %v2081_v2 = vsel %vm2069_vm3, %v2021_v21, %v2020_v54  ;;  %v2901_v52 = vunpack.c.l.b16 %v3399_v46  ;;  %v1071_v62 = vcombine.high %v4182_v43, %v4182_v43  ;;  %v1078_v38 = vrot.slane %v4182_v43, %v3748_v26 }
 0x164   : > { %v2082_v10 = vsel %vm2071_vm4, %v2022_v3, %v2081_v2  ;;  %v2255_v1 = vmin.f32 %v2253_v50, %v2254_v42  ;;  %v2290_v29 = vrot.slane %v2289_v39, 1  ;;  %v3400_v6 = vpack.c.bf16 %v2246_v61, %v2246_v61 }
 0x165   : > { %v2026_v35 = vunpack.c.l.b16 %v3349_v23  ;;  %v2083_v40 = vsel %vm2073_vm5, %v4099_v55, %v2082_v10  ;;  %v4197_v49 = vmul.f32 %v4182_v43, %v4182_v43  ;;  %v1085_v9 = vrot.slane %v1071_v62, %v3748_v26 }
 0x166   : > { %v2084_v28 = vsel %vm2075_vm6, %v4101_v47, %v2083_v40  ;;  %v2291_v45 = vmin.f32 %v2289_v39, %v2290_v29  ;;  %v3401_v51 = vpack.c.bf16 %v2255_v1, %v2255_v1  ;;  %v2902_v34 = vunpack.c.l.b16 %v3400_v6  ;;  %v3017_v40 = vld [vmem:[%s3970_s29 + $0x4] sm:$0xf] }
 0x167   : > { %5089 = vst [vmem:[#allocation25_spill] sm:$0xff] %v4197_v49  ;;  %v2085_v12 = vsel %vm2077_vm7, %v4103_v30, %v2084_v28  ;;  %v4204_v58 = vcombine.high %v1078_v38, %v1078_v38  ;;  %v4206_v55 = vcombine.high %v1085_v9, %v1085_v9  ;;  %v4209_v7 = vsel %vm387_vm0, %v1078_v38, -inf }
 0x168   : > { %v2086_v54 = vsel %vm2079_vm8, %v2026_v35, %v2085_v12  ;;  %v3405_v47 = vpack.c.bf16 %v2291_v45, %v2291_v45  ;;  %v2903_v48 = vunpack.c.l.b16 %v3401_v51  ;;  %v2956_v4 = vsel %vm2069_vm3, %v2902_v34, %v2901_v52 }
 0x169   : > { %v2124_v50 = vpack.c.b16 %v2086_v54, %v2086_v54  ;;  %v4215_v15 = vsel %vm387_vm0, %v1085_v9, -inf  ;;  %v4217_v30 = vmax.f32 %v3481_v57, 0.0  ;;  %v4219_v23 = vmax.f32 %v508_v22, 0.0 }
 0x16a   : > { %v2907_v21 = vunpack.c.l.b16 %v3405_v47  ;;  %v2957_v3 = vsel %vm2071_vm4, %v2903_v48, %v2956_v4  ;;  %v4223_v46 = vsel %vm387_vm0, %v1078_v38, inf  ;;  %v4226_v61 = vsel %vm387_vm0, %v1085_v9, inf }
 0x16b   : > { %5090 = vst [vmem:[#allocation26_spill] sm:$0xff] %v4219_v23  ;;  %v2146_v42 = vsel %vm3993_vm11, %v2124_v50, %v2145_v60  ;;  %v2958_v39 = vsel %vm2073_vm5, %v4106_v37, %v2957_v3  ;;  %v867_v2 = vcombine.high %v4217_v30, %v4217_v30  ;;  %v1627_v52 = vsel %vm387_vm0, %v3843_v5, -inf }
 0x16c   : > { %2147 = vst [vmem:[%s3965_s23 + $0x4] sm:$0xf] %v2146_v42  ;;  %v2959_v62 = vsel %vm2075_vm6, %v4108_v41, %v2958_v39  ;;  %v874_v38 = vrot.slane %v4217_v30, %v3748_v26  ;;  %v1037_v10 = vcombine.high %v4219_v23, %v4219_v23  ;;  %v1645_v1 = vsel %vm387_vm0, %v3845_v14, -inf }
 0x16d   : > { %v2960_v37 = vsel %vm2077_vm7, %v4130_v18, %v2959_v62  ;;  %v4249_v29 = vmul.f32 %v4217_v30, %v4217_v30  ;;  %v881_v6 = vrot.slane %v867_v2, %v3748_v26  ;;  %v1044_v41 = vrot.slane %v4219_v23, %v3748_v26 }
 0x16e   : > { %v2961_v35 = vsel %vm2079_vm8, %v2907_v21, %v2960_v37  ;;  %v4256_v9 = vcombine.high %v874_v38, %v874_v38  ;;  %v4260_v28 = vmul.f32 %v4219_v23, %v4219_v23  ;;  %v4265_v18 = vsel %vm2071_vm4, %v4086_v53, %v4168_v11 }
 0x16f   : > { %v2999_v45 = vpack.c.b16 %v2961_v35, %v2961_v35  ;;  %v4267_v51 = vcombine.high %v881_v6, %v881_v6  ;;  %v4270_v34 = vsel %vm387_vm0, %v874_v38, -inf  ;;  %v4273_v57 = vsel %vm387_vm0, %v874_v38, inf }
 0x170   : > { %5091 = vst [vmem:[#allocation27_spill] sm:$0xff] %v4260_v28  ;;  %v4276_v22 = vsel %vm387_vm0, %v881_v6, -inf  ;;  %v4279_v12 = vsel %vm387_vm0, %v881_v6, inf  ;;  %v1051_v54 = vrot.slane %v1037_v10, %v3748_v26  ;;  %v1052_v60 = vcombine.high %v1044_v41, %v1044_v41 }
 0x171   : > { %v3018_v53 = vsel %vm3993_vm11, %v2999_v45, %v3017_v40  ;;  %v1628_v11 = vsel %vm387_vm0, %v1044_v41, -inf  ;;  %v2508_v47 = vsel %vm387_vm0, %v3843_v5, inf  ;;  %v2509_v48 = vsel %vm387_vm0, %v1044_v41, inf }
 0x172   : > { %3019 = vst [vmem:[%s3970_s29 + $0x4] sm:$0xf] %v3018_v53  ;;  %v1053_v4 = vcombine.high %v1051_v54, %v1051_v54  ;;  %v1629_v50 = vmax.f32 %v1627_v52, %v1628_v11  ;;  %v1637_v21 = vsel %vm387_vm0, %v1052_v60, -inf  ;;  %v1646_v3 = vsel %vm387_vm0, %v1051_v54, -inf }
 0x173   : > { %v1638_v42 = vmax.f32 %v3854_v17, %v1637_v21  ;;  %v1647_v39 = vmax.f32 %v1645_v1, %v1646_v3  ;;  %v2510_v2 = vmin.f32 %v2508_v47, %v2509_v48  ;;  %v2518_v62 = vsel %vm387_vm0, %v1052_v60, inf }
 0x174   : > { %v1630_v38 = vrot.slane %v1629_v50, 4  ;;  %v1655_v10 = vsel %vm387_vm0, %v1053_v4, -inf  ;;  %v2519_v5 = vmin.f32 %v3869_v31, %v2518_v62  ;;  %v2526_v37 = vsel %vm387_vm0, %v3845_v14, inf }
 0x175   : > { %v1639_v6 = vrot.slane %v1638_v42, 4  ;;  %v1648_v52 = vrot.slane %v1647_v39, 4  ;;  %v1656_v41 = vmax.f32 %v4035_v32, %v1655_v10  ;;  %v2511_v35 = vrot.slane %v2510_v2, 4 }
 0x176   : > { %v1631_v40 = vmax.f32 %v1629_v50, %v1630_v38  ;;  %v2520_v45 = vrot.slane %v2519_v5, 4  ;;  %v2527_v17 = vsel %vm387_vm0, %v1051_v54, inf  ;;  %v2536_v1 = vsel %vm387_vm0, %v1053_v4, inf }
 0x177   : > { %v1640_v60 = vmax.f32 %v1638_v42, %v1639_v6  ;;  %v1649_v53 = vmax.f32 %v1647_v39, %v1648_v52  ;;  %v1657_v11 = vrot.slane %v1656_v41, 4  ;;  %v2512_v47 = vmin.f32 %v2510_v2, %v2511_v35 }
 0x178   : > { %v1632_v48 = vrot.slane %v1631_v40, 2  ;;  %v2521_v31 = vmin.f32 %v2519_v5, %v2520_v45  ;;  %v2528_v21 = vmin.f32 %v2526_v37, %v2527_v17  ;;  %v2537_v14 = vmin.f32 %v4045_v63, %v2536_v1 }
 0x179   : > { %v1641_v3 = vrot.slane %v1640_v60, 2  ;;  %v1650_v62 = vrot.slane %v1649_v53, 2  ;;  %v1658_v49 = vmax.f32 %v1656_v41, %v1657_v11  ;;  %v2513_v32 = vrot.slane %v2512_v47, 2 }
 0x17a   : > { %v1633_v10 = vmax.f32 %v1631_v40, %v1632_v48  ;;  %v2522_v50 = vrot.slane %v2521_v31, 2  ;;  %v2529_v38 = vrot.slane %v2528_v21, 4  ;;  %v2538_v43 = vrot.slane %v2537_v14, 4 }
 0x17b   : > { %v1642_v54 = vmax.f32 %v1640_v60, %v1641_v3  ;;  %v1651_v28 = vmax.f32 %v1649_v53, %v1650_v62  ;;  %v1659_v4 = vrot.slane %v1658_v49, 2  ;;  %v2514_v42 = vmin.f32 %v2512_v47, %v2513_v32 }
 0x17c   : > { %v1634_v39 = vrot.slane %v1633_v10, 1  ;;  %v2523_v6 = vmin.f32 %v2521_v31, %v2522_v50  ;;  %v2530_v2 = vmin.f32 %v2528_v21, %v2529_v38  ;;  %v2539_v52 = vmin.f32 %v2537_v14, %v2538_v43 }
 0x17d   : > { %v1643_v5 = vrot.slane %v1642_v54, 1  ;;  %v1652_v37 = vrot.slane %v1651_v28, 1  ;;  %v1660_v35 = vmax.f32 %v1658_v49, %v1659_v4  ;;  %v2515_v63 = vrot.slane %v2514_v42, 1 }
 0x17e   : > { %v1635_v45 = vmax.f32 %v1633_v10, %v1634_v39  ;;  %v2524_v17 = vrot.slane %v2523_v6, 1  ;;  %v2531_v41 = vrot.slane %v2530_v2, 2  ;;  %v2540_v1 = vrot.slane %v2539_v52, 2  ;;  %v460_v10 = vpop.f32.mrf.mxu0 }
 0x17f   : > { %v1644_v40 = vmax.f32 %v1642_v54, %v1643_v5  ;;  %v1653_v11 = vmax.f32 %v1651_v28, %v1652_v37  ;;  %v1661_v48 = vrot.slane %v1660_v35, 1  ;;  %v2516_v23 = vmin.f32 %v2514_v42, %v2515_v63 }
 0x180   : > { %v3374_v60 = vpack.c.bf16 %v1635_v45, %v1635_v45  ;;  %v2525_v53 = vmin.f32 %v2523_v6, %v2524_v17  ;;  %v2532_v3 = vmin.f32 %v2530_v2, %v2531_v41  ;;  %v2541_v47 = vmin.f32 %v2539_v52, %v2540_v1  ;;  %v3482_v41 = vpop.f32.mrf.mxu0  ;;  %v2157_v1 = vld [vmem:[%s3965_s23 + $0x14] sm:$0xf] }
 0x181   : > { %v1662_v62 = vmax.f32 %v1660_v35, %v1661_v48  ;;  %v3375_v31 = vpack.c.bf16 %v1644_v40, %v1644_v40  ;;  %v3376_v21 = vpack.c.bf16 %v1653_v11, %v1653_v11  ;;  %v3430_v43 = vpack.c.bf16 %v2516_v23, %v2516_v23 }
 0x182   : > { %v2051_v14 = vunpack.c.l.b16 %v3374_v60  ;;  %v2533_v32 = vrot.slane %v2532_v3, 1  ;;  %v2542_v49 = vrot.slane %v2541_v47, 1  ;;  %v3431_v50 = vpack.c.bf16 %v2525_v53, %v2525_v53 }
 0x183   : > { %v3377_v38 = vpack.c.bf16 %v1662_v62, %v1662_v62  ;;  %v2052_v4 = vunpack.c.l.b16 %v3375_v31  ;;  %v2053_v39 = vunpack.c.l.b16 %v3376_v21  ;;  %v2932_v28 = vunpack.c.l.b16 %v3430_v43 }
 0x184   : > { %v2107_v54 = vsel %vm2073_vm5, %v2051_v14, %v4265_v18  ;;  %v2534_v42 = vmin.f32 %v2532_v3, %v2533_v32  ;;  %v2543_v6 = vmin.f32 %v2541_v47, %v2542_v49  ;;  %v2933_v2 = vunpack.c.l.b16 %v3431_v50  ;;  %v3029_v14 = vld [vmem:[%s3970_s29 + $0x14] sm:$0xf]  ;;  %v3494_v50 = vpop.f32.mrf.mxu1 }
 0x185   : > { %v2054_v52 = vunpack.c.l.b16 %v3377_v38  ;;  %v2108_v5 = vsel %vm2075_vm6, %v2052_v4, %v2107_v54  ;;  %v2981_v23 = vsel %vm2071_vm4, %v4088_v33, %v4185_v20  ;;  %v547_v37 = vmax.f32 %v460_v10, 0.0 }
 0x186   : > { %v2109_v35 = vsel %vm2077_vm7, %v2053_v39, %v2108_v5  ;;  %v3432_v63 = vpack.c.bf16 %v2534_v42, %v2534_v42  ;;  %v3433_v45 = vpack.c.bf16 %v2543_v6, %v2543_v6  ;;  %v2982_v17 = vsel %vm2073_vm5, %v2932_v28, %v2981_v23 }
 0x187   : > { %v2110_v18 = vsel %vm2079_vm8, %v2054_v52, %v2109_v35  ;;  %v2983_v40 = vsel %vm2075_vm6, %v2933_v2, %v2982_v17  ;;  %v573_v11 = vadd.f32 %v4148_v0, %v4072_v8  ;;  %v608_v48 = vmul.f32 %v547_v37, %v547_v37 }
 0x188   : > { %v2128_v33 = vpack.c.b16 %v2110_v18, %v2110_v18  ;;  %v2934_v20 = vunpack.c.l.b16 %v3432_v63  ;;  %v2935_v60 = vunpack.c.l.b16 %v3433_v45  ;;  %v634_v53 = vadd.f32 %v4154_v56, %v4124_v25 }
 0x189   : > { %v4316_v3 = vadd.f32 %v573_v11, %v547_v37  ;;  %v833_v47 = vcombine.high %v547_v37, %v547_v37  ;;  %v840_v62 = vrot.slane %v547_v37, %v3748_v26  ;;  %v4319_v31 = vmax.f32 %v3482_v41, 0.0 }
 0x18a   : > { %v1466_v21 = vsel %vm387_vm0, %v4256_v9, -inf  ;;  %v2158_v8 = vsel %vm3993_vm11, %v2128_v33, %v2157_v1  ;;  %v2984_v0 = vsel %vm2077_vm7, %v2934_v20, %v2983_v40  ;;  %v4326_v43 = vadd.f32 %v634_v53, %v608_v48 }
 0x18b   : > { %v2347_v25 = vsel %vm387_vm0, %v4256_v9, inf  ;;  %2159 = vst [vmem:[%s3965_s23 + $0x14] sm:$0xf] %v2158_v8  ;;  %v2985_v56 = vsel %vm2079_vm8, %v2935_v60, %v2984_v0  ;;  %v847_v32 = vrot.slane %v833_v47, %v3748_v26  ;;  %v848_v49 = vcombine.high %v840_v62, %v840_v62 }
 0x18c   : > { %v3003_v10 = vpack.c.b16 %v2985_v56, %v2985_v56  ;;  %v4335_v38 = vsel %vm387_vm0, %v840_v62, -inf  ;;  %v884_v4 = vcombine.high %v4319_v31, %v4319_v31  ;;  %v4339_v39 = vmax.f32 %v3494_v50, 0.0 }
 0x18d   : > { %v849_v28 = vcombine.high %v847_v32, %v847_v32  ;;  %v1456_v9 = vsel %vm387_vm0, %v848_v49, -inf  ;;  %v1465_v54 = vsel %vm387_vm0, %v847_v32, -inf  ;;  %v2337_v42 = vsel %vm387_vm0, %v848_v49, inf }
 0x18e   : > { %5092 = vst [vmem:[#allocation28_spill] sm:$0xff] %v4339_v39  ;;  %v3030_v6 = vsel %vm3993_vm11, %v3003_v10, %v3029_v14  ;;  %v1458_v2 = vmax.f32 %v1456_v9, %v4270_v34  ;;  %v1467_v52 = vmax.f32 %v1465_v54, %v1466_v21  ;;  %v2339_v5 = vmin.f32 %v2337_v42, %v4273_v57 }
 0x18f   : > { %3031 = vst [vmem:[%s3970_s29 + $0x14] sm:$0xf] %v3030_v6  ;;  %v1412_v23 = vsel %vm387_vm0, %v849_v28, -inf  ;;  %v2293_v37 = vsel %vm387_vm0, %v849_v28, inf  ;;  %v2346_v35 = vsel %vm387_vm0, %v847_v32, inf  ;;  %v891_v63 = vrot.slane %v4319_v31, %v3748_v26 }
 0x190   : > { %v1413_v45 = vmax.f32 %v4140_v16, %v1412_v23  ;;  %v1459_v17 = vrot.slane %v1458_v2, 4  ;;  %v1468_v41 = vrot.slane %v1467_v52, 4  ;;  %v2294_v18 = vmin.f32 %v4143_v19, %v2293_v37 }
 0x191   : > { %v4357_v34 = vsel %vm387_vm0, %v840_v62, inf  ;;  %v2340_v57 = vrot.slane %v2339_v5, 4  ;;  %v2348_v1 = vmin.f32 %v2346_v35, %v2347_v25  ;;  %v898_v40 = vrot.slane %v884_v4, %v3748_v26 }
 0x192   : > { %v1414_v11 = vrot.slane %v1413_v45, 4  ;;  %v1460_v48 = vmax.f32 %v1458_v2, %v1459_v17  ;;  %v1469_v33 = vmax.f32 %v1467_v52, %v1468_v41  ;;  %v2295_v20 = vrot.slane %v2294_v18, 4 }
 0x193   : > { %v2341_v60 = vmin.f32 %v2339_v5, %v2340_v57  ;;  %v2349_v53 = vrot.slane %v2348_v1, 4  ;;  %v4362_v16 = vmul.f32 %v4319_v31, %v4319_v31  ;;  %v4364_v47 = vcombine.high %v891_v63, %v891_v63 }
 0x194   : > { %v1415_v19 = vmax.f32 %v1413_v45, %v1414_v11  ;;  %v1461_v21 = vrot.slane %v1460_v48, 2  ;;  %v1470_v62 = vrot.slane %v1469_v33, 2  ;;  %v2296_v8 = vmin.f32 %v2294_v18, %v2295_v20 }
 0x195   : > { %5093 = vst [vmem:[#allocation29_spill] sm:$0xff] %v4364_v47  ;;  %v2342_v0 = vrot.slane %v2341_v60, 2  ;;  %v2350_v25 = vmin.f32 %v2348_v1, %v2349_v53  ;;  %v4366_v56 = vcombine.high %v898_v40, %v898_v40  ;;  %v4369_v14 = vsel %vm387_vm0, %v891_v63, -inf }
 0x196   : > { %v1416_v32 = vrot.slane %v1415_v19, 2  ;;  %v1462_v49 = vmax.f32 %v1460_v48, %v1461_v21  ;;  %v1471_v50 = vmax.f32 %v1469_v33, %v1470_v62  ;;  %v2297_v10 = vrot.slane %v2296_v8, 2 }
 0x197   : > { %5094 = vst [vmem:[#allocation30_spill] sm:$0xff] %v4366_v56  ;;  %v2343_v4 = vmin.f32 %v2341_v60, %v2342_v0  ;;  %v2351_v28 = vrot.slane %v2350_v25, 2  ;;  %v4372_v9 = vsel %vm387_vm0, %v898_v40, -inf  ;;  %v4375_v54 = vsel %vm387_vm0, %v891_v63, inf }
 0x198   : > { %5095 = vst [vmem:[#allocation31_spill] sm:$0xff] %v4372_v9  ;;  %v1417_v42 = vmax.f32 %v1415_v19, %v1416_v32  ;;  %v1463_v6 = vrot.slane %v1462_v49, 1  ;;  %v1472_v2 = vrot.slane %v1471_v50, 1  ;;  %v2298_v52 = vmin.f32 %v2296_v8, %v2297_v10 }
 0x199   : > { %v2344_v5 = vrot.slane %v2343_v4, 1  ;;  %v2352_v23 = vmin.f32 %v2350_v25, %v2351_v28  ;;  %v1088_v37 = vcombine.high %v4339_v39, %v4339_v39  ;;  %v1095_v35 = vrot.slane %v4339_v39, %v3748_v26  ;;  %v463_v28 = vpop.f32.mrf.mxu0 }
 0x19a   : > { %v1418_v45 = vrot.slane %v1417_v42, 1  ;;  %v1464_v17 = vmax.f32 %v1462_v49, %v1463_v6  ;;  %v1473_v41 = vmax.f32 %v1471_v50, %v1472_v2  ;;  %v2299_v18 = vrot.slane %v2298_v52, 1 }
 0x19b   : > { %v2345_v57 = vmin.f32 %v2343_v4, %v2344_v5  ;;  %v2353_v1 = vrot.slane %v2352_v23, 1  ;;  %v1102_v63 = vrot.slane %v1088_v37, %v3748_v26  ;;  %v1103_v11 = vcombine.high %v1095_v35, %v1095_v35 }
 0x19c   : > { %v1419_v48 = vmax.f32 %v1417_v42, %v1418_v45  ;;  %v3355_v33 = vpack.c.bf16 %v1464_v17, %v1464_v17  ;;  %v3356_v20 = vpack.c.bf16 %v1473_v41, %v1473_v41  ;;  %v2300_v60 = vmin.f32 %v2298_v52, %v2299_v18 }
 0x19d   : > { %v2354_v53 = vmin.f32 %v2352_v23, %v2353_v1  ;;  %v3411_v19 = vpack.c.bf16 %v2345_v57, %v2345_v57  ;;  %v4383_v21 = vsel %vm387_vm0, %v898_v40, inf  ;;  %v1104_v62 = vcombine.high %v1102_v63, %v1102_v63 }
 0x19e   : > { %5096 = vst [vmem:[#allocation32_spill] sm:$0xff] %v4383_v21  ;;  %v3350_v8 = vpack.c.bf16 %v1419_v48, %v1419_v48  ;;  %v3406_v0 = vpack.c.bf16 %v2300_v60, %v2300_v60  ;;  %v4387_v25 = vmul.f32 %v4339_v39, %v4339_v39  ;;  %v4390_v32 = vsel %vm387_vm0, %v1095_v35, -inf }
 0x19f   : > { %v4392_v49 = vunpack.c.l.b16 %v3355_v33  ;;  %v4394_v50 = vunpack.c.l.b16 %v3356_v20  ;;  %v3412_v10 = vpack.c.bf16 %v2354_v53, %v2354_v53  ;;  %v4396_v4 = vunpack.c.l.b16 %v3411_v19 }
 0x1a0   : > { %5097 = vst [vmem:[#allocation33_spill] sm:$0xff] %v4387_v25  ;;  %v4398_v40 = vunpack.c.l.b16 %v3350_v8  ;;  %v4401_v42 = vsel %vm387_vm0, %v1103_v11, -inf  ;;  %v4404_v6 = vsel %vm387_vm0, %v1102_v63, -inf  ;;  %v1700_v2 = vsel %vm387_vm0, %v1104_v62, -inf }
 0x1a1   : > { %v4407_v52 = vunpack.c.l.b16 %v3406_v0  ;;  %v4409_v5 = vunpack.c.l.b16 %v3412_v10  ;;  %v1701_v23 = vmax.f32 %v4209_v7, %v1700_v2  ;;  %v4413_v37 = vsel %vm387_vm0, %v1095_v35, inf }
 0x1a2   : > { %v4416_v45 = vsel %vm387_vm0, %v1103_v11, inf  ;;  %v4419_v17 = vsel %vm387_vm0, %v1102_v63, inf  ;;  %v2581_v41 = vsel %vm387_vm0, %v1104_v62, inf  ;;  %v548_v18 = vmax.f32 %v463_v28, 0.0 }
 0x1a3   : > { %v1702_v57 = vrot.slane %v1701_v23, 4  ;;  %v2582_v1 = vmin.f32 %v4223_v46, %v2581_v41  ;;  %v1420_v48 = vsel %vm387_vm0, %v4135_v59, -inf  ;;  %v1438_v7 = vsel %vm387_vm0, %v4137_v27, -inf }
 0x1a4   : > { %v575_v35 = vadd.f32 %v4316_v3, %v548_v18  ;;  %v609_v33 = vmul.f32 %v548_v18, %v548_v18  ;;  %v850_v11 = vcombine.high %v548_v18, %v548_v18  ;;  %v857_v20 = vrot.slane %v548_v18, %v3748_v26 }
 0x1a5   : > { %v1703_v63 = vmax.f32 %v1701_v23, %v1702_v57  ;;  %v2583_v60 = vrot.slane %v2582_v1, 4  ;;  %v2301_v53 = vsel %vm387_vm0, %v4135_v59, inf  ;;  %v4433_v46 = vsel %vm387_vm0, %v4137_v27, inf }
 0x1a6   : > { %v4436_v19 = vadd.f32 %v575_v35, %v4217_v30  ;;  %v636_v62 = vadd.f32 %v4326_v43, %v609_v33  ;;  %v864_v3 = vrot.slane %v850_v11, %v3748_v26  ;;  %v865_v8 = vcombine.high %v857_v20, %v857_v20 }
 0x1a7   : > { %v1704_v0 = vrot.slane %v1703_v63, 2  ;;  %v2584_v10 = vmin.f32 %v2582_v1, %v2583_v60  ;;  %v1421_v28 = vsel %vm387_vm0, %v857_v20, -inf  ;;  %v2302_v2 = vsel %vm387_vm0, %v857_v20, inf }
 0x1a8   : > { %v4443_v59 = vadd.f32 %v636_v62, %v4249_v29  ;;  %v866_v23 = vcombine.high %v864_v3, %v864_v3  ;;  %v1422_v27 = vmax.f32 %v1420_v48, %v1421_v28  ;;  %v1430_v41 = vsel %vm387_vm0, %v865_v8, -inf }
 0x1a9   : > { %v1705_v30 = vmax.f32 %v1703_v63, %v1704_v0  ;;  %v2585_v18 = vrot.slane %v2584_v10, 2  ;;  %v1431_v43 = vmax.f32 %v4159_v36, %v1430_v41  ;;  %v1439_v57 = vsel %vm387_vm0, %v864_v3, -inf  ;;  %v511_v0 = vpop.f32.mrf.mxu1 }
 0x1aa   : > { %v1423_v35 = vrot.slane %v1422_v27, 4  ;;  %v1440_v33 = vmax.f32 %v1438_v7, %v1439_v57  ;;  %v1448_v1 = vsel %vm387_vm0, %v866_v23, -inf  ;;  %v2303_v11 = vmin.f32 %v2301_v53, %v2302_v2 }
 0x1ab   : > { %v1706_v60 = vrot.slane %v1705_v30, 1  ;;  %v2586_v20 = vmin.f32 %v2584_v10, %v2585_v18  ;;  %v1432_v25 = vrot.slane %v1431_v43, 4  ;;  %v1449_v29 = vmax.f32 %v4335_v38, %v1448_v1 }
 0x1ac   : > { %v1424_v62 = vmax.f32 %v1422_v27, %v1423_v35  ;;  %v1441_v48 = vrot.slane %v1440_v33, 4  ;;  %v2304_v28 = vrot.slane %v2303_v11, 4  ;;  %v2311_v63 = vsel %vm387_vm0, %v865_v8, inf }
 0x1ad   : > { %v1707_v39 = vmax.f32 %v1705_v30, %v1706_v60  ;;  %v2587_v36 = vrot.slane %v2586_v20, 1  ;;  %v1433_v41 = vmax.f32 %v1431_v43, %v1432_v25  ;;  %v1450_v21 = vrot.slane %v1449_v29, 4 }
 0x1ae   : > { %v1425_v9 = vrot.slane %v1424_v62, 2  ;;  %v1442_v7 = vmax.f32 %v1440_v33, %v1441_v48  ;;  %v2305_v57 = vmin.f32 %v2303_v11, %v2304_v28  ;;  %v2312_v53 = vmin.f32 %v4171_v24, %v2311_v63 }
 0x1af   : > { %v3382_v2 = vpack.c.bf16 %v1707_v39, %v1707_v39  ;;  %v1434_v10 = vrot.slane %v1433_v41, 2  ;;  %v1451_v18 = vmax.f32 %v1449_v29, %v1450_v21  ;;  %v4452_v56 = vmax.f32 %v511_v0, 0.0 }
 0x1b0   : > { %v1426_v38 = vmax.f32 %v1424_v62, %v1425_v9  ;;  %v1443_v27 = vrot.slane %v1442_v7, 2  ;;  %v2306_v35 = vrot.slane %v2305_v57, 2  ;;  %v2313_v1 = vrot.slane %v2312_v53, 4 }
 0x1b1   : > { %5098 = vst [vmem:[#allocation34_spill] sm:$0xff] %v4452_v56  ;;  %v4454_v8 = vmin.f32 %v2586_v20, %v2587_v36  ;;  %v1435_v30 = vmax.f32 %v1433_v41, %v1434_v10  ;;  %v1452_v60 = vrot.slane %v1451_v18, 2  ;;  %v4458_v25 = vsel %vm387_vm0, %v4206_v55, -inf }
 0x1b2   : > { %v1427_v43 = vrot.slane %v1426_v38, 1  ;;  %v1444_v33 = vmax.f32 %v1442_v7, %v1443_v27  ;;  %v2307_v24 = vmin.f32 %v2305_v57, %v2306_v35  ;;  %v2314_v39 = vmin.f32 %v2312_v53, %v2313_v1 }
 0x1b3   : > { %v4460_v11 = vunpack.c.l.b16 %v3382_v2  ;;  %v1436_v21 = vrot.slane %v1435_v30, 1  ;;  %v1453_v29 = vmax.f32 %v1451_v18, %v1452_v60  ;;  %v2320_v9 = vsel %vm387_vm0, %v864_v3, inf }
 0x1b4   : > { %v1428_v62 = vmax.f32 %v1426_v38, %v1427_v43  ;;  %v1445_v48 = vrot.slane %v1444_v33, 1  ;;  %v2308_v20 = vrot.slane %v2307_v24, 1  ;;  %v2315_v28 = vrot.slane %v2314_v39, 2 }
 0x1b5   : > { %v1437_v63 = vmax.f32 %v1435_v30, %v1436_v21  ;;  %v1454_v0 = vrot.slane %v1453_v29, 1  ;;  %v2321_v36 = vmin.f32 %v4433_v46, %v2320_v9  ;;  %v2329_v41 = vsel %vm387_vm0, %v866_v23, inf }
 0x1b6   : > { %v1446_v10 = vmax.f32 %v1444_v33, %v1445_v48  ;;  %v3351_v7 = vpack.c.bf16 %v1428_v62, %v1428_v62  ;;  %v2309_v57 = vmin.f32 %v2307_v24, %v2308_v20  ;;  %v2316_v53 = vmin.f32 %v2314_v39, %v2315_v28 }
 0x1b7   : > { %v1455_v2 = vmax.f32 %v1453_v29, %v1454_v0  ;;  %v3352_v27 = vpack.c.bf16 %v1437_v63, %v1437_v63  ;;  %v2322_v35 = vrot.slane %v2321_v36, 4  ;;  %v2330_v18 = vmin.f32 %v4357_v34, %v2329_v41 }
 0x1b8   : > { %v3353_v3 = vpack.c.bf16 %v1446_v10, %v1446_v10  ;;  %v2028_v38 = vunpack.c.l.b16 %v3351_v7  ;;  %v2317_v1 = vrot.slane %v2316_v53, 1  ;;  %v3407_v60 = vpack.c.bf16 %v2309_v57, %v2309_v57  ;;  %v2148_v57 = vld [vmem:[%s3965_s23 + $0x8] sm:$0xf] }
 0x1b9   : > { %v3354_v43 = vpack.c.bf16 %v1455_v2, %v1455_v2  ;;  %v2029_v30 = vunpack.c.l.b16 %v3352_v27  ;;  %v2323_v21 = vmin.f32 %v2321_v36, %v2322_v35  ;;  %v2331_v47 = vrot.slane %v2330_v18, 4 }
 0x1ba   : > { %v2030_v46 = vunpack.c.l.b16 %v3353_v3  ;;  %v2087_v23 = vsel %vm2069_vm3, %v2028_v38, %v4398_v40  ;;  %v2318_v33 = vmin.f32 %v2316_v53, %v2317_v1  ;;  %v2909_v24 = vunpack.c.l.b16 %v3407_v60 }
 0x1bb   : > { %v2031_v39 = vunpack.c.l.b16 %v3354_v43  ;;  %v2088_v29 = vsel %vm2071_vm4, %v2029_v30, %v2087_v23  ;;  %v2324_v9 = vrot.slane %v2323_v21, 2  ;;  %v2332_v34 = vmin.f32 %v2330_v18, %v2331_v47 }
 0x1bc   : > { %v3438_v62 = vpack.c.bf16 %v4454_v8, %v4454_v8  ;;  %v2089_v48 = vsel %vm2073_vm5, %v2030_v46, %v2088_v29  ;;  %v3408_v20 = vpack.c.bf16 %v2318_v33, %v2318_v33  ;;  %v2962_v28 = vsel %vm2069_vm3, %v2909_v24, %v4407_v52 }
 0x1bd   : > { %v2090_v63 = vsel %vm2075_vm6, %v2031_v39, %v2089_v48  ;;  %v2325_v40 = vmin.f32 %v2323_v21, %v2324_v9  ;;  %v2333_v0 = vrot.slane %v2332_v34, 2  ;;  %v1054_v36 = vcombine.high %v4452_v56, %v4452_v56 }
 0x1be   : > { %v2091_v41 = vsel %vm2077_vm7, %v4392_v49, %v2090_v63  ;;  %v2910_v47 = vunpack.c.l.b16 %v3408_v20  ;;  %v1061_v10 = vrot.slane %v4452_v56, %v3748_v26  ;;  %v2545_v7 = vsel %vm387_vm0, %v4206_v55, inf }
 0x1bf   : > { %v2092_v52 = vsel %vm2079_vm8, %v4394_v50, %v2091_v41  ;;  %v2326_v53 = vrot.slane %v2325_v40, 1  ;;  %v2334_v2 = vmin.f32 %v2332_v34, %v2333_v0  ;;  %v1068_v27 = vrot.slane %v1054_v36, %v3748_v26 }
 0x1c0   : > { %v2125_v35 = vpack.c.b16 %v2092_v52, %v2092_v52  ;;  %v2963_v18 = vsel %vm2071_vm4, %v2910_v47, %v2962_v28  ;;  %v1069_v49 = vcombine.high %v1061_v10, %v1061_v10  ;;  %v1663_v3 = vsel %vm387_vm0, %v1061_v10, -inf }
 0x1c1   : > { %v2327_v38 = vmin.f32 %v2325_v40, %v2326_v53  ;;  %v2335_v1 = vrot.slane %v2334_v2, 1  ;;  %v4489_v60 = vcombine.high %v1068_v27, %v1068_v27  ;;  %v1665_v55 = vmax.f32 %v1663_v3, %v4458_v25 }
 0x1c2   : > { %v2149_v50 = vsel %vm3993_vm11, %v2125_v35, %v2148_v57  ;;  %v1672_v43 = vsel %vm387_vm0, %v1069_v49, -inf  ;;  %v1681_v30 = vsel %vm387_vm0, %v1068_v27, -inf  ;;  %v2544_v21 = vsel %vm387_vm0, %v1061_v10, inf }
 0x1c3   : > { %2150 = vst [vmem:[%s3965_s23 + $0x8] sm:$0xf] %v2149_v50  ;;  %v2336_v46 = vmin.f32 %v2334_v2, %v2335_v1  ;;  %v3409_v23 = vpack.c.bf16 %v2327_v38, %v2327_v38  ;;  %v1666_v33 = vrot.slane %v1665_v55, 4  ;;  %v1674_v24 = vmax.f32 %v1672_v43, %v4390_v32  ;;  %v3020_v1 = vld [vmem:[%s3970_s29 + $0x8] sm:$0xf] }
 0x1c4   : > { %v1683_v39 = vmax.f32 %v1681_v30, %v4401_v42  ;;  %v1690_v25 = vsel %vm387_vm0, %v4489_v60, -inf  ;;  %v2546_v29 = vmin.f32 %v2544_v21, %v2545_v7  ;;  %v2553_v9 = vsel %vm387_vm0, %v1069_v49, inf }
 0x1c5   : > { %v3410_v34 = vpack.c.bf16 %v2336_v46, %v2336_v46  ;;  %v2911_v48 = vunpack.c.l.b16 %v3409_v23  ;;  %v1667_v20 = vmax.f32 %v1665_v55, %v1666_v33  ;;  %v1675_v28 = vrot.slane %v1674_v24, 4 }
 0x1c6   : > { %v1684_v63 = vrot.slane %v1683_v39, 4  ;;  %v1692_v40 = vmax.f32 %v1690_v25, %v4404_v6  ;;  %v2547_v0 = vrot.slane %v2546_v29, 4  ;;  %v2555_v36 = vmin.f32 %v2553_v9, %v4413_v37 }
 0x1c7   : > { %v2912_v41 = vunpack.c.l.b16 %v3410_v34  ;;  %v2964_v32 = vsel %vm2073_vm5, %v2911_v48, %v2963_v18  ;;  %v1668_v42 = vrot.slane %v1667_v20, 2  ;;  %v1676_v47 = vmax.f32 %v1674_v24, %v1675_v28 }
 0x1c8   : > { %v1685_v10 = vmax.f32 %v1683_v39, %v1684_v63  ;;  %v1693_v7 = vrot.slane %v1692_v40, 4  ;;  %v2548_v52 = vmin.f32 %v2546_v29, %v2547_v0  ;;  %v2556_v57 = vrot.slane %v2555_v36, 4 }
 0x1c9   : > { %v2965_v53 = vsel %vm2075_vm6, %v2912_v41, %v2964_v32  ;;  %v1669_v2 = vmax.f32 %v1667_v20, %v1668_v42  ;;  %v1677_v35 = vrot.slane %v1676_v47, 2  ;;  %v2562_v49 = vsel %vm387_vm0, %v1068_v27, inf }
 0x1ca   : > { %v2966_v6 = vsel %vm2077_vm7, %v4396_v4, %v2965_v53  ;;  %v1686_v37 = vrot.slane %v1685_v10, 2  ;;  %v1694_v3 = vmax.f32 %v1692_v40, %v1693_v7  ;;  %v2549_v38 = vrot.slane %v2548_v52, 2 }
 0x1cb   : > { %v2967_v18 = vsel %vm2079_vm8, %v4409_v5, %v2966_v6  ;;  %v1670_v55 = vrot.slane %v1669_v2, 1  ;;  %v1678_v50 = vmax.f32 %v1676_v47, %v1677_v35  ;;  %v2557_v43 = vmin.f32 %v2555_v36, %v2556_v57  ;;  %v3485_v36 = vpop.f32.mrf.mxu0 }
 0x1cc   : > { %v3000_v30 = vpack.c.b16 %v2967_v18, %v2967_v18  ;;  %v1687_v21 = vmax.f32 %v1685_v10, %v1686_v37  ;;  %v1695_v46 = vrot.slane %v1694_v3, 2  ;;  %v2550_v23 = vmin.f32 %v2548_v52, %v2549_v38 }
 0x1cd   : > { %v1671_v33 = vmax.f32 %v1669_v2, %v1670_v55  ;;  %v1679_v27 = vrot.slane %v1678_v50, 1  ;;  %v2558_v24 = vrot.slane %v2557_v43, 2  ;;  %v2564_v4 = vmin.f32 %v2562_v49, %v4416_v45 }
 0x1ce   : > { %v3021_v39 = vsel %vm3993_vm11, %v3000_v30, %v3020_v1  ;;  %v1688_v25 = vrot.slane %v1687_v21, 1  ;;  %v1696_v29 = vmax.f32 %v1694_v3, %v1695_v46  ;;  %v2551_v5 = vrot.slane %v2550_v23, 1  ;;  %v476_v30 = vpop.f32.mrf.mxu0 }
 0x1cf   : > { %3022 = vst [vmem:[%s3970_s29 + $0x8] sm:$0xf] %v3021_v39  ;;  %v1680_v9 = vmax.f32 %v1678_v50, %v1679_v27  ;;  %v3378_v34 = vpack.c.bf16 %v1671_v33, %v1671_v33  ;;  %v2559_v48 = vmin.f32 %v2557_v43, %v2558_v24  ;;  %v2565_v20 = vrot.slane %v2564_v4, 4 }
 0x1d0   : > { %v1689_v28 = vmax.f32 %v1687_v21, %v1688_v25  ;;  %v1697_v63 = vrot.slane %v1696_v29, 1  ;;  %v2552_v40 = vmin.f32 %v2550_v23, %v2551_v5  ;;  %v2571_v0 = vsel %vm387_vm0, %v4489_v60, inf  ;;  %v3497_v23 = vpop.f32.mrf.mxu1 }
 0x1d1   : > { %v3379_v41 = vpack.c.bf16 %v1680_v9, %v1680_v9  ;;  %v2055_v45 = vunpack.c.l.b16 %v3378_v34  ;;  %v2560_v32 = vrot.slane %v2559_v48, 1  ;;  %v2566_v42 = vmin.f32 %v2564_v4, %v2565_v20 }
 0x1d2   : > { %v1698_v47 = vmax.f32 %v1696_v29, %v1697_v63  ;;  %v3380_v10 = vpack.c.bf16 %v1689_v28, %v1689_v28  ;;  %v2573_v7 = vmin.f32 %v2571_v0, %v4419_v17  ;;  %v3434_v52 = vpack.c.bf16 %v2552_v40, %v2552_v40 }
 0x1d3   : > { %v2056_v57 = vunpack.c.l.b16 %v3379_v41  ;;  %v2561_v53 = vmin.f32 %v2559_v48, %v2560_v32  ;;  %v2567_v2 = vrot.slane %v2566_v42, 2  ;;  %v4520_v35 = vmax.f32 %v3485_v36, 0.0  ;;  %v5102_v41 = vld [vmem:[#allocation12_spill] sm:$0xff] }
 0x1d4   : > { %v4525_v49 = vunpack.c.l.b16 %v3438_v62  ;;  %v3381_v60 = vpack.c.bf16 %v1698_v47, %v1698_v47  ;;  %v2057_v6 = vunpack.c.l.b16 %v3380_v10  ;;  %v2574_v37 = vrot.slane %v2573_v7, 4 }
 0x1d5   : > { %v2111_v3 = vsel %vm2069_vm3, %v2056_v57, %v2055_v45  ;;  %v2568_v38 = vmin.f32 %v2566_v42, %v2567_v2  ;;  %v3435_v18 = vpack.c.bf16 %v2561_v53, %v2561_v53  ;;  %v2936_v1 = vunpack.c.l.b16 %v3434_v52  ;;  %v5103_v42 = vld [vmem:[#allocation14_spill] sm:$0xff]  ;;  %v5104_v52 = vld [vmem:[#allocation13_spill] sm:$0xff] }
 0x1d6   : > { %v2058_v17 = vunpack.c.l.b16 %v3381_v60  ;;  %v2112_v55 = vsel %vm2071_vm4, %v2057_v6, %v2111_v3  ;;  %v2575_v50 = vmin.f32 %v2573_v7, %v2574_v37  ;;  %v935_v43 = vcombine.high %v4520_v35, %v4520_v35  ;;  %v5105_v37 = vld [vmem:[#allocation15_spill] sm:$0xff] }
 0x1d7   : > { %v4533_v8 = vmul.f32 %v4452_v56, %v4452_v56  ;;  %v2569_v62 = vrot.slane %v2568_v38, 1  ;;  %v2937_v21 = vunpack.c.l.b16 %v3435_v18  ;;  %v942_v46 = vrot.slane %v4520_v35, %v3748_v26 }
 0x1d8   : > { %v2576_v33 = vrot.slane %v2575_v50, 2  ;;  %v4539_v27 = vmul.f32 %v4520_v35, %v4520_v35  ;;  %v949_v24 = vrot.slane %v935_v43, %v3748_v26  ;;  %v4542_v4 = vmax.f32 %v3497_v23, 0.0  ;;  %v5106_v23 = vld [vmem:[#allocation16_spill] sm:$0xff] }
 0x1d9   : > { %5099 = vst [vmem:[#allocation35_spill] sm:$0xff] %v4533_v8  ;;  %v4545_v39 = vsel %vm2073_vm5, %v2058_v17, %v2112_v55  ;;  %v2570_v25 = vmin.f32 %v2568_v38, %v2569_v62  ;;  %v950_v29 = vcombine.high %v942_v46, %v942_v46  ;;  %v4547_v5 = vmax.f32 %v476_v30, 0.0 }
 0x1da   : > { %5100 = vst [vmem:[#allocation36_spill] sm:$0xff] %v4539_v27  ;;  %5101 = vst [vmem:[#allocation37_spill] sm:$0xff] %v4542_v4  ;;  %v2577_v9 = vmin.f32 %v2575_v50, %v2576_v33  ;;  %v2986_v34 = vsel %vm2069_vm3, %v2937_v21, %v2936_v1  ;;  %v951_v48 = vcombine.high %v949_v24, %v949_v24  ;;  %v1555_v20 = vsel %vm387_vm0, %v949_v24, -inf }
 0x1db   : > { %v3436_v28 = vpack.c.bf16 %v2570_v25, %v2570_v25  ;;  %v1546_v63 = vsel %vm387_vm0, %v950_v29, -inf  ;;  %v1557_v40 = vmax.f32 %v1555_v20, %v3946_v13  ;;  %v2427_v0 = vsel %vm387_vm0, %v950_v29, inf }
 0x1dc   : > { %v2578_v36 = vrot.slane %v2577_v9, 1  ;;  %v1548_v45 = vmax.f32 %v1546_v63, %v5102_v41  ;;  %v1564_v32 = vsel %vm387_vm0, %v951_v48, -inf  ;;  %v2429_v47 = vmin.f32 %v2427_v0, %v5103_v42 }
 0x1dd   : > { %v2938_v10 = vunpack.c.l.b16 %v3436_v28  ;;  %v1558_v7 = vrot.slane %v1557_v40, 4  ;;  %v1566_v57 = vmax.f32 %v1564_v32, %v5104_v52  ;;  %v2436_v53 = vsel %vm387_vm0, %v949_v24, inf }
 0x1de   : > { %v2579_v2 = vmin.f32 %v2577_v9, %v2578_v36  ;;  %v1549_v60 = vrot.slane %v1548_v45, 4  ;;  %v2430_v6 = vrot.slane %v2429_v47, 4  ;;  %v2438_v13 = vmin.f32 %v2436_v53, %v5105_v37 }
 0x1df   : > { %v4561_v3 = vsel %vm387_vm0, %v942_v46, -inf  ;;  %v1559_v38 = vmax.f32 %v1557_v40, %v1558_v7  ;;  %v1567_v18 = vrot.slane %v1566_v57, 4  ;;  %v2445_v1 = vsel %vm387_vm0, %v951_v48, inf }
 0x1e0   : > { %v3437_v17 = vpack.c.bf16 %v2579_v2, %v2579_v2  ;;  %v1550_v55 = vmax.f32 %v1548_v45, %v1549_v60  ;;  %v2431_v50 = vmin.f32 %v2429_v47, %v2430_v6  ;;  %v2439_v43 = vrot.slane %v2438_v13, 4 }
 0x1e1   : > { %v1560_v30 = vrot.slane %v1559_v38, 2  ;;  %v1568_v62 = vmax.f32 %v1566_v57, %v1567_v18  ;;  %v4565_v21 = vsel %vm387_vm0, %v942_v46, inf  ;;  %v2447_v33 = vmin.f32 %v2445_v1, %v5106_v23 }
 0x1e2   : > { %v2987_v24 = vsel %vm2071_vm4, %v2938_v10, %v2986_v34  ;;  %v1551_v25 = vrot.slane %v1550_v55, 2  ;;  %v2432_v29 = vrot.slane %v2431_v50, 2  ;;  %v2440_v9 = vmin.f32 %v2438_v13, %v2439_v43 }
 0x1e3   : > { %v1561_v20 = vmax.f32 %v1559_v38, %v1560_v30  ;;  %v1569_v28 = vrot.slane %v1568_v62, 2  ;;  %v2448_v63 = vrot.slane %v2447_v33, 4  ;;  %v1139_v48 = vcombine.high %v4542_v4, %v4542_v4 }
 0x1e4   : > { %v2939_v40 = vunpack.c.l.b16 %v3437_v17  ;;  %v1552_v0 = vmax.f32 %v1550_v55, %v1551_v25  ;;  %v2433_v36 = vmin.f32 %v2431_v50, %v2432_v29  ;;  %v2441_v41 = vrot.slane %v2440_v9, 2 }
 0x1e5   : > { %v1562_v45 = vrot.slane %v1561_v20, 1  ;;  %v1570_v46 = vmax.f32 %v1568_v62, %v1569_v28  ;;  %v2449_v32 = vmin.f32 %v2447_v33, %v2448_v63  ;;  %v1146_v42 = vrot.slane %v4542_v4, %v3748_v26 }
 0x1e6   : > { %v1553_v34 = vrot.slane %v1552_v0, 1  ;;  %v2434_v47 = vrot.slane %v2433_v36, 1  ;;  %v2442_v10 = vmin.f32 %v2440_v9, %v2441_v41  ;;  %v1153_v7 = vrot.slane %v1139_v48, %v3748_v26 }
 0x1e7   : > { %v1563_v52 = vmax.f32 %v1561_v20, %v1562_v45  ;;  %v1571_v57 = vrot.slane %v1570_v46, 1  ;;  %v2450_v53 = vrot.slane %v2449_v32, 2  ;;  %v1154_v2 = vcombine.high %v1146_v42, %v1146_v42 }
 0x1e8   : > { %v1554_v60 = vmax.f32 %v1552_v0, %v1553_v34  ;;  %v2435_v6 = vmin.f32 %v2433_v36, %v2434_v47  ;;  %v2443_v37 = vrot.slane %v2442_v10, 1  ;;  %v4576_v13 = vmul.f32 %v4542_v4, %v4542_v4  ;;  %v524_v0 = vpop.f32.mrf.mxu1 }
 0x1e9   : > { %v4579_v38 = vsel %vm2073_vm5, %v2939_v40, %v2987_v24  ;;  %v1572_v18 = vmax.f32 %v1570_v46, %v1571_v57  ;;  %v3366_v1 = vpack.c.bf16 %v1563_v52, %v1563_v52  ;;  %v2451_v17 = vmin.f32 %v2449_v32, %v2450_v53 }
 0x1ea   : > { %5107 = vst [vmem:[#allocation12_spill] sm:$0xff] %v4576_v13  ;;  %v3365_v55 = vpack.c.bf16 %v1554_v60, %v1554_v60  ;;  %v2444_v50 = vmin.f32 %v2442_v10, %v2443_v37  ;;  %v3421_v43 = vpack.c.bf16 %v2435_v6, %v2435_v6  ;;  %v4581_v30 = vcombine.high %v1153_v7, %v1153_v7 }
 0x1eb   : > { %v3367_v62 = vpack.c.bf16 %v1572_v18, %v1572_v18  ;;  %v2452_v23 = vrot.slane %v2451_v17, 1  ;;  %v4584_v33 = vsel %vm387_vm0, %v1154_v2, -inf  ;;  %v4587_v25 = vsel %vm387_vm0, %v1153_v7, -inf }
 0x1ec   : > { %5108 = vst [vmem:[#allocation14_spill] sm:$0xff] %v4581_v30  ;;  %v4589_v29 = vunpack.c.l.b16 %v3365_v55  ;;  %v4591_v24 = vunpack.c.l.b16 %v3366_v1  ;;  %v3422_v9 = vpack.c.bf16 %v2444_v50, %v2444_v50  ;;  %v4594_v20 = vsel %vm387_vm0, %v1146_v42, -inf }
 0x1ed   : > { %v4596_v28 = vunpack.c.l.b16 %v3367_v62  ;;  %v2453_v63 = vmin.f32 %v2451_v17, %v2452_v23  ;;  %v4598_v48 = vunpack.c.l.b16 %v3421_v43  ;;  %v4601_v40 = vsel %vm387_vm0, %v1154_v2, inf }
 0x1ee   : > { %v4604_v36 = vsel %vm387_vm0, %v1153_v7, inf  ;;  %v4607_v41 = vsel %vm387_vm0, %v1146_v42, inf  ;;  %v577_v45 = vadd.f32 %v4436_v19, %v4319_v31  ;;  %v638_v46 = vadd.f32 %v4443_v59, %v4362_v16 }
 0x1ef   : > { %v3423_v32 = vpack.c.bf16 %v2453_v63, %v2453_v63  ;;  %v612_v34 = vmul.f32 %v4547_v5, %v4547_v5  ;;  %v901_v47 = vcombine.high %v4547_v5, %v4547_v5  ;;  %v4619_v10 = vrot.slane %v4547_v5, %v3748_v26 }
 0x1f0   : > { %v4621_v7 = vunpack.c.l.b16 %v3422_v9  ;;  %v4624_v42 = vadd.f32 %v577_v45, %v4547_v5  ;;  %v1483_v31 = vsel %vm387_vm0, %v4267_v51, -inf  ;;  %v4628_v16 = vmax.f32 %v524_v0, 0.0 }
 0x1f1   : > { %v4630_v19 = vadd.f32 %v638_v46, %v612_v34  ;;  %v915_v59 = vrot.slane %v901_v47, %v3748_v26  ;;  %v916_v52 = vcombine.high %v4619_v10, %v4619_v10  ;;  %v2364_v57 = vsel %vm387_vm0, %v4267_v51, inf }
 0x1f2   : > { %v4637_v53 = vunpack.c.l.b16 %v3423_v32  ;;  %v4641_v5 = vsel %vm387_vm0, %v4619_v10, -inf  ;;  %v1105_v2 = vcombine.high %v4628_v16, %v4628_v16  ;;  %v4647_v60 = vrot.slane %v4628_v16, %v3748_v26 }
 0x1f3   : > { %5109 = vst [vmem:[#allocation13_spill] sm:$0xff] %v4630_v19  ;;  %5110 = vst [vmem:[#allocation15_spill] sm:$0xff] %v4641_v5  ;;  %v917_v6 = vcombine.high %v915_v59, %v915_v59  ;;  %v1475_v37 = vsel %vm387_vm0, %v916_v52, -inf  ;;  %v1484_v18 = vsel %vm387_vm0, %v915_v59, -inf  ;;  %v2356_v51 = vsel %vm387_vm0, %v916_v52, inf }
 0x1f4   : > { %v1476_v1 = vmax.f32 %v4276_v22, %v1475_v37  ;;  %v1485_v17 = vmax.f32 %v1483_v31, %v1484_v18  ;;  %v2357_v55 = vmin.f32 %v4279_v12, %v2356_v51  ;;  %v2365_v50 = vsel %vm387_vm0, %v915_v59, inf }
 0x1f5   : > { %v1493_v43 = vsel %vm387_vm0, %v917_v6, -inf  ;;  %v2366_v62 = vmin.f32 %v2364_v57, %v2365_v50  ;;  %v2374_v23 = vsel %vm387_vm0, %v917_v6, inf  ;;  %v4658_v9 = vrot.slane %v1105_v2, %v3748_v26 }
 0x1f6   : > { %v1477_v63 = vrot.slane %v1476_v1, 4  ;;  %v1486_v0 = vrot.slane %v1485_v17, 4  ;;  %v1494_v45 = vmax.f32 %v4369_v14, %v1493_v43  ;;  %v2358_v46 = vrot.slane %v2357_v55, 4 }
 0x1f7   : > { %v2367_v32 = vrot.slane %v2366_v62, 4  ;;  %v2375_v22 = vmin.f32 %v4375_v54, %v2374_v23  ;;  %v4664_v12 = vcombine.high %v4647_v60, %v4647_v60  ;;  %v4668_v34 = vcombine.high %v4658_v9, %v4658_v9 }
 0x1f8   : > { %v1478_v47 = vmax.f32 %v1476_v1, %v1477_v63  ;;  %v1487_v31 = vmax.f32 %v1485_v17, %v1486_v0  ;;  %v1495_v59 = vrot.slane %v1494_v45, 4  ;;  %v2359_v52 = vmin.f32 %v2357_v55, %v2358_v46 }
 0x1f9   : > { %v2368_v57 = vmin.f32 %v2366_v62, %v2367_v32  ;;  %v2376_v2 = vrot.slane %v2375_v22, 4  ;;  %v1708_v14 = vsel %vm387_vm0, %v4204_v58, -inf  ;;  %v1709_v54 = vsel %vm387_vm0, %v4647_v60, -inf }
 0x1fa   : > { %v1479_v6 = vrot.slane %v1478_v47, 2  ;;  %v1488_v37 = vrot.slane %v1487_v31, 2  ;;  %v1496_v18 = vmax.f32 %v1494_v45, %v1495_v59  ;;  %v2360_v51 = vrot.slane %v2359_v52, 2 }
 0x1fb   : > { %v2369_v50 = vrot.slane %v2368_v57, 2  ;;  %v2377_v43 = vmin.f32 %v2375_v22, %v2376_v2  ;;  %v1710_v23 = vmax.f32 %v1708_v14, %v1709_v54  ;;  %v1718_v1 = vsel %vm387_vm0, %v4664_v12, -inf }
 0x1fc   : > { %v1480_v17 = vmax.f32 %v1478_v47, %v1479_v6  ;;  %v1489_v55 = vmax.f32 %v1487_v31, %v1488_v37  ;;  %v1497_v62 = vrot.slane %v1496_v18, 2  ;;  %v2361_v63 = vmin.f32 %v2359_v52, %v2360_v51 }
 0x1fd   : > { %v2370_v0 = vmin.f32 %v2368_v57, %v2369_v50  ;;  %v2378_v46 = vrot.slane %v2377_v43, 2  ;;  %v1711_v32 = vrot.slane %v1710_v23, 4  ;;  %v1719_v13 = vmax.f32 %v4215_v15, %v1718_v1 }
 0x1fe   : > { %v1481_v4 = vrot.slane %v1480_v17, 1  ;;  %v1490_v30 = vrot.slane %v1489_v55, 1  ;;  %v1498_v8 = vmax.f32 %v1496_v18, %v1497_v62  ;;  %v2362_v45 = vrot.slane %v2361_v63, 1 }
 0x1ff   : > { %v2371_v59 = vrot.slane %v2370_v0, 1  ;;  %v2379_v56 = vmin.f32 %v2377_v43, %v2378_v46  ;;  %v1712_v22 = vmax.f32 %v1710_v23, %v1711_v32  ;;  %v1720_v2 = vrot.slane %v1719_v13, 4 }
 0x200   : > { %v1482_v14 = vmax.f32 %v1480_v17, %v1481_v4  ;;  %v1491_v54 = vmax.f32 %v1489_v55, %v1490_v30  ;;  %v1499_v5 = vrot.slane %v1498_v8, 1  ;;  %v2363_v47 = vmin.f32 %v2361_v63, %v2362_v45 }
 0x201   : > { %v2372_v31 = vmin.f32 %v2370_v0, %v2371_v59  ;;  %v2380_v6 = vrot.slane %v2379_v56, 1  ;;  %v1713_v52 = vrot.slane %v1712_v22, 2  ;;  %v1721_v57 = vmax.f32 %v1719_v13, %v1720_v2 }
 0x202   : > { %v1500_v37 = vmax.f32 %v1498_v8, %v1499_v5  ;;  %v3357_v51 = vpack.c.bf16 %v1482_v14, %v1482_v14  ;;  %v3358_v50 = vpack.c.bf16 %v1491_v54, %v1491_v54  ;;  %v3413_v15 = vpack.c.bf16 %v2363_v47, %v2363_v47 }
 0x203   : > { %v2381_v1 = vmin.f32 %v2379_v56, %v2380_v6  ;;  %v3414_v27 = vpack.c.bf16 %v2372_v31, %v2372_v31  ;;  %v1714_v18 = vmax.f32 %v1712_v22, %v1713_v52  ;;  %v1722_v62 = vrot.slane %v1721_v57, 2 }
 0x204   : > { %v3359_v19 = vpack.c.bf16 %v1500_v37, %v1500_v37  ;;  %v2034_v43 = vunpack.c.l.b16 %v3357_v51  ;;  %v2035_v23 = vunpack.c.l.b16 %v3358_v50  ;;  %v4679_v4 = vsel %vm387_vm0, %v4619_v10, inf }
 0x205   : > { %v2915_v30 = vunpack.c.l.b16 %v3413_v15  ;;  %v4683_v17 = vmul.f32 %v4628_v16, %v4628_v16  ;;  %v1715_v8 = vrot.slane %v1714_v18, 1  ;;  %v1723_v13 = vmax.f32 %v1721_v57, %v1722_v62 }
 0x206   : > { %v3415_v5 = vpack.c.bf16 %v2381_v1, %v2381_v1  ;;  %v2916_v55 = vunpack.c.l.b16 %v3414_v27  ;;  %v1726_v56 = vsel %vm387_vm0, %v4658_v9, -inf  ;;  %v1735_v63 = vsel %vm387_vm0, %v4668_v34, -inf }
 0x207   : > { %v4689_v0 = vunpack.c.l.b16 %v3359_v19  ;;  %v4692_v10 = vsel %vm2069_vm3, %v2035_v23, %v2034_v43  ;;  %v1716_v46 = vmax.f32 %v1714_v18, %v1715_v8  ;;  %v1724_v32 = vrot.slane %v1723_v13, 1  ;;  %v2160_v23 = vld [vmem:[%s3965_s23 + $0x18] sm:$0xf] }
 0x208   : > { %v1728_v45 = vmax.f32 %v1726_v56, %v4584_v33  ;;  %v1737_v59 = vmax.f32 %v1735_v63, %v4587_v25  ;;  %v2114_v27 = vsel %vm2075_vm6, %v4460_v11, %v4545_v39  ;;  %v2589_v22 = vsel %vm387_vm0, %v4204_v58, inf }
 0x209   : > { %v1725_v2 = vmax.f32 %v1723_v13, %v1724_v32  ;;  %v3383_v14 = vpack.c.bf16 %v1716_v46, %v1716_v46  ;;  %v2590_v19 = vsel %vm387_vm0, %v4647_v60, inf  ;;  %v2599_v54 = vsel %vm387_vm0, %v4664_v12, inf }
 0x20a   : > { %v1729_v47 = vrot.slane %v1728_v45, 4  ;;  %v1738_v31 = vrot.slane %v1737_v59, 4  ;;  %v2591_v33 = vmin.f32 %v2589_v22, %v2590_v19  ;;  %v2600_v25 = vmin.f32 %v4226_v61, %v2599_v54 }
 0x20b   : > { %v3384_v6 = vpack.c.bf16 %v1725_v2, %v1725_v2  ;;  %v2060_v52 = vunpack.c.l.b16 %v3383_v14  ;;  %v2607_v11 = vsel %vm387_vm0, %v4658_v9, inf  ;;  %v2616_v58 = vsel %vm387_vm0, %v4668_v34, inf  ;;  %v3486_v9 = vpop.f32.mrf.mxu0 }
 0x20c   : > { %v1730_v39 = vmax.f32 %v1728_v45, %v1729_v47  ;;  %v1739_v57 = vmax.f32 %v1737_v59, %v1738_v31  ;;  %v2592_v60 = vrot.slane %v2591_v33, 4  ;;  %v2601_v37 = vrot.slane %v2600_v25, 4 }
 0x20d   : > { %v2061_v51 = vunpack.c.l.b16 %v3384_v6  ;;  %v2115_v12 = vsel %vm2077_vm7, %v2060_v52, %v2114_v27  ;;  %v2609_v50 = vmin.f32 %v2607_v11, %v4601_v40  ;;  %v2618_v61 = vmin.f32 %v2616_v58, %v4604_v36 }
 0x20e   : > { %v1731_v15 = vrot.slane %v1730_v39, 2  ;;  %v1740_v1 = vrot.slane %v1739_v57, 2  ;;  %v2593_v18 = vmin.f32 %v2591_v33, %v2592_v60  ;;  %v2602_v62 = vmin.f32 %v2600_v25, %v2601_v37 }
 0x20f   : > { %v4713_v43 = vunpack.c.l.b16 %v3415_v5  ;;  %v2116_v34 = vsel %vm2079_vm8, %v2061_v51, %v2115_v12  ;;  %v2610_v8 = vrot.slane %v2609_v50, 4  ;;  %v2619_v13 = vrot.slane %v2618_v61, 4 }
 0x210   : > { %v1732_v56 = vmax.f32 %v1730_v39, %v1731_v15  ;;  %v1741_v63 = vmax.f32 %v1739_v57, %v1740_v1  ;;  %v2129_v46 = vpack.c.b16 %v2116_v34, %v2116_v34  ;;  %v2594_v32 = vrot.slane %v2593_v18, 2 }
 0x211   : > { %v2603_v40 = vrot.slane %v2602_v62, 2  ;;  %v2611_v45 = vmin.f32 %v2609_v50, %v2610_v8  ;;  %v2620_v36 = vmin.f32 %v2618_v61, %v2619_v13  ;;  %v4717_v59 = vmax.f32 %v3486_v9, 0.0 }
 0x212   : > { %v1733_v27 = vrot.slane %v1732_v56, 1  ;;  %v1742_v22 = vrot.slane %v1741_v63, 1  ;;  %v2161_v5 = vsel %vm3993_vm11, %v2129_v46, %v2160_v23  ;;  %v2595_v2 = vmin.f32 %v2593_v18, %v2594_v32 }
 0x213   : > { %v4722_v14 = vsel %vm2069_vm3, %v2916_v55, %v2915_v30  ;;  %2162 = vst [vmem:[%s3965_s23 + $0x18] sm:$0xf] %v2161_v5  ;;  %v2604_v19 = vmin.f32 %v2602_v62, %v2603_v40  ;;  %v2612_v54 = vrot.slane %v2611_v45, 2  ;;  %v2621_v47 = vrot.slane %v2620_v36, 2 }
 0x214   : > { %v1734_v31 = vmax.f32 %v1732_v56, %v1733_v27  ;;  %v1743_v33 = vmax.f32 %v1741_v63, %v1742_v22  ;;  %v2596_v25 = vrot.slane %v2595_v2, 1  ;;  %v952_v6 = vcombine.high %v4717_v59, %v4717_v59  ;;  %v5111_v56 = vld [vmem:[#allocation11_spill] sm:$0xff]  ;;  %v5112_v27 = vld [vmem:[#allocation20_spill] sm:$0xff] }
 0x215   : > { %v2605_v52 = vrot.slane %v2604_v19, 1  ;;  %v2613_v11 = vmin.f32 %v2611_v45, %v2612_v54  ;;  %v2622_v58 = vmin.f32 %v2620_v36, %v2621_v47  ;;  %v959_v39 = vrot.slane %v4717_v59, %v3748_v26  ;;  %v3032_v47 = vld [vmem:[%s3970_s29 + $0x18] sm:$0xf] }
 0x216   : > { %v3385_v57 = vpack.c.bf16 %v1734_v31, %v1734_v31  ;;  %v3386_v60 = vpack.c.bf16 %v1743_v33, %v1743_v33  ;;  %v2597_v30 = vmin.f32 %v2595_v2, %v2596_v25  ;;  %v966_v55 = vrot.slane %v952_v6, %v3748_v26  ;;  %v5113_v6 = vld [vmem:[#allocation21_spill] sm:$0xff] }
 0x217   : > { %v2606_v37 = vmin.f32 %v2604_v19, %v2605_v52  ;;  %v2614_v51 = vrot.slane %v2613_v11, 1  ;;  %v2623_v12 = vrot.slane %v2622_v58, 1  ;;  %v967_v50 = vcombine.high %v959_v39, %v959_v39 }
 0x218   : > { %v3439_v61 = vpack.c.bf16 %v2597_v30, %v2597_v30  ;;  %v2989_v15 = vsel %vm2075_vm6, %v4525_v49, %v4579_v38  ;;  %v4735_v1 = vmul.f32 %v4717_v59, %v4717_v59  ;;  %v968_v18 = vcombine.high %v966_v55, %v966_v55 }
 0x219   : > { %v4737_v62 = vmin.f32 %v2613_v11, %v2614_v51  ;;  %v4739_v9 = vmin.f32 %v2622_v58, %v2623_v12  ;;  %v3440_v34 = vpack.c.bf16 %v2606_v37, %v2606_v37  ;;  %v1573_v23 = vsel %vm387_vm0, %v959_v39, -inf }
 0x21a   : > { %v2941_v8 = vunpack.c.l.b16 %v3439_v61  ;;  %v1538_v13 = vsel %vm387_vm0, %v968_v18, -inf  ;;  %v1574_v63 = vsel %vm387_vm0, %v5111_v56, -inf  ;;  %v1582_v49 = vsel %vm387_vm0, %v967_v50, -inf }
 0x21b   : > { %v4746_v38 = vunpack.c.l.b16 %v3385_v57  ;;  %v4748_v46 = vunpack.c.l.b16 %v3386_v60  ;;  %v2942_v32 = vunpack.c.l.b16 %v3440_v34  ;;  %v1539_v40 = vmax.f32 %v4561_v3, %v1538_v13 }
 0x21c   : > { %v2990_v45 = vsel %vm2077_vm7, %v2941_v8, %v2989_v15  ;;  %v1575_v36 = vmax.f32 %v1573_v23, %v1574_v63  ;;  %v1584_v22 = vmax.f32 %v1582_v49, %v5112_v27  ;;  %v1591_v5 = vsel %vm387_vm0, %v966_v55, -inf }
 0x21d   : > { %v3441_v2 = vpack.c.bf16 %v4737_v62, %v4737_v62  ;;  %v3442_v19 = vpack.c.bf16 %v4739_v9, %v4739_v9  ;;  %v2991_v54 = vsel %vm2079_vm8, %v2942_v32, %v2990_v45  ;;  %v1540_v31 = vrot.slane %v1539_v40, 4 }
 0x21e   : > { %v3004_v33 = vpack.c.b16 %v2991_v54, %v2991_v54  ;;  %v1576_v3 = vrot.slane %v1575_v36, 4  ;;  %v1585_v25 = vrot.slane %v1584_v22, 4  ;;  %v1593_v52 = vmax.f32 %v1591_v5, %v5113_v6  ;;  %v5115_v54 = vld [vmem:[#allocation23_spill] sm:$0xff] }
 0x21f   : > { %v1541_v11 = vmax.f32 %v1539_v40, %v1540_v31  ;;  %v2419_v58 = vsel %vm387_vm0, %v968_v18, inf  ;;  %v2454_v57 = vsel %vm387_vm0, %v959_v39, inf  ;;  %v2455_v60 = vsel %vm387_vm0, %v5111_v56, inf  ;;  %v5114_v39 = vld [vmem:[#allocation22_spill] sm:$0xff] }
 0x220   : > { %v3033_v30 = vsel %vm3993_vm11, %v3004_v33, %v3032_v47  ;;  %v1577_v37 = vmax.f32 %v1575_v36, %v1576_v3  ;;  %v1586_v51 = vmax.f32 %v1584_v22, %v1585_v25  ;;  %v1594_v12 = vrot.slane %v1593_v52, 4 }
 0x221   : > { %3034 = vst [vmem:[%s3970_s29 + $0x18] sm:$0xf] %v3033_v30  ;;  %v1542_v61 = vrot.slane %v1541_v11, 2  ;;  %v2420_v15 = vmin.f32 %v4565_v21, %v2419_v58  ;;  %v2456_v62 = vmin.f32 %v2454_v57, %v2455_v60  ;;  %v2463_v34 = vsel %vm387_vm0, %v967_v50, inf }
 0x222   : > { %v1578_v23 = vrot.slane %v1577_v37, 2  ;;  %v1587_v18 = vrot.slane %v1586_v51, 2  ;;  %v1595_v8 = vmax.f32 %v1593_v52, %v1594_v12  ;;  %v2465_v13 = vmin.f32 %v2463_v34, %v5114_v39 }
 0x223   : > { %v1543_v63 = vmax.f32 %v1541_v11, %v1542_v61  ;;  %v2421_v56 = vrot.slane %v2420_v15, 4  ;;  %v2457_v49 = vrot.slane %v2456_v62, 4  ;;  %v2472_v32 = vsel %vm387_vm0, %v966_v55, inf }
 0x224   : > { %v1579_v40 = vmax.f32 %v1577_v37, %v1578_v23  ;;  %v1588_v45 = vmax.f32 %v1586_v51, %v1587_v18  ;;  %v1596_v36 = vrot.slane %v1595_v8, 2  ;;  %v2466_v27 = vrot.slane %v2465_v13, 4 }
 0x225   : > { %v1544_v22 = vrot.slane %v1543_v63, 1  ;;  %v2422_v5 = vmin.f32 %v2420_v15, %v2421_v56  ;;  %v2458_v21 = vmin.f32 %v2456_v62, %v2457_v49  ;;  %v2474_v47 = vmin.f32 %v2472_v32, %v5115_v54 }
 0x226   : > { %v1580_v50 = vrot.slane %v1579_v40, 1  ;;  %v1589_v31 = vrot.slane %v1588_v45, 1  ;;  %v1597_v33 = vmax.f32 %v1595_v8, %v1596_v36  ;;  %v2467_v3 = vmin.f32 %v2465_v13, %v2466_v27  ;;  %v3498_v27 = vpop.f32.mrf.mxu1 }
 0x227   : > { %v1545_v25 = vmax.f32 %v1543_v63, %v1544_v22  ;;  %v2423_v6 = vrot.slane %v2422_v5, 2  ;;  %v2459_v52 = vrot.slane %v2458_v21, 2  ;;  %v2475_v11 = vrot.slane %v2474_v47, 4 }
 0x228   : > { %v1581_v58 = vmax.f32 %v1579_v40, %v1580_v50  ;;  %v1590_v57 = vmax.f32 %v1588_v45, %v1589_v31  ;;  %v1598_v55 = vrot.slane %v1597_v33, 1  ;;  %v2468_v60 = vrot.slane %v2467_v3, 2 }
 0x229   : > { %v3364_v30 = vpack.c.bf16 %v1545_v25, %v1545_v25  ;;  %v2424_v37 = vmin.f32 %v2422_v5, %v2423_v6  ;;  %v2460_v51 = vmin.f32 %v2458_v21, %v2459_v52  ;;  %v2476_v12 = vmin.f32 %v2474_v47, %v2475_v11 }
 0x22a   : > { %v1599_v61 = vmax.f32 %v1597_v33, %v1598_v55  ;;  %v3368_v15 = vpack.c.bf16 %v1581_v58, %v1581_v58  ;;  %v3369_v62 = vpack.c.bf16 %v1590_v57, %v1590_v57  ;;  %v2469_v34 = vmin.f32 %v2467_v3, %v2468_v60  ;;  %v2154_v57 = vld [vmem:[%s3965_s23 + $0x10] sm:$0xf] }
 0x22b   : > { %v2041_v23 = vunpack.c.l.b16 %v3364_v30  ;;  %v2425_v18 = vrot.slane %v2424_v37, 1  ;;  %v2461_v8 = vrot.slane %v2460_v51, 1  ;;  %v2477_v39 = vrot.slane %v2476_v12, 2 }
 0x22c   : > { %v4773_v13 = vunpack.c.l.b16 %v3441_v2  ;;  %v3370_v63 = vpack.c.bf16 %v1599_v61, %v1599_v61  ;;  %v2045_v56 = vunpack.c.l.b16 %v3368_v15  ;;  %v2470_v49 = vrot.slane %v2469_v34, 1 }
 0x22d   : > { %v2099_v32 = vsel %vm2069_vm3, %v4589_v29, %v2041_v23  ;;  %v2426_v40 = vmin.f32 %v2424_v37, %v2425_v18  ;;  %v2462_v45 = vmin.f32 %v2460_v51, %v2461_v8  ;;  %v2478_v36 = vmin.f32 %v2476_v12, %v2477_v39 }
 0x22e   : > { %v2046_v22 = vunpack.c.l.b16 %v3369_v62  ;;  %v2100_v5 = vsel %vm2071_vm4, %v4591_v24, %v2099_v32  ;;  %v2471_v21 = vmin.f32 %v2469_v34, %v2470_v49  ;;  %v4779_v54 = vmax.f32 %v3498_v27, 0.0 }
 0x22f   : > { %v2101_v2 = vsel %vm2073_vm5, %v4596_v28, %v2100_v5  ;;  %v2479_v47 = vrot.slane %v2478_v36, 1  ;;  %v3420_v50 = vpack.c.bf16 %v2426_v40, %v2426_v40  ;;  %v3424_v31 = vpack.c.bf16 %v2462_v45, %v2462_v45  ;;  %v479_v28 = vpop.f32.mrf.mxu0  ;;  %v3026_v45 = vld [vmem:[%s3970_s29 + $0x10] sm:$0xf] }
 0x230   : > { %v4786_v29 = vunpack.c.l.b16 %v3442_v19  ;;  %v2047_v33 = vunpack.c.l.b16 %v3370_v63  ;;  %v2102_v3 = vsel %vm2075_vm6, %v2045_v56, %v2101_v2  ;;  %v1156_v24 = vcombine.high %v4779_v54, %v4779_v54 }
 0x231   : > { %v2103_v25 = vsel %vm2077_vm7, %v2046_v22, %v2102_v3  ;;  %v2480_v6 = vmin.f32 %v2478_v36, %v2479_v47  ;;  %v3425_v52 = vpack.c.bf16 %v2471_v21, %v2471_v21  ;;  %v2922_v11 = vunpack.c.l.b16 %v3420_v50  ;;  %v5117_v3 = vld [vmem:[#allocation29_spill] sm:$0xff] }
 0x232   : > { %v2104_v58 = vsel %vm2079_vm8, %v2047_v33, %v2103_v25  ;;  %v4796_v9 = vmul.f32 %v4779_v54, %v4779_v54  ;;  %v1163_v19 = vrot.slane %v4779_v54, %v3748_v26  ;;  %v4801_v55 = vrot.slane %v1156_v24, %v3748_v26 }
 0x233   : > { %v2127_v60 = vpack.c.b16 %v2104_v58, %v2104_v58  ;;  %v3426_v30 = vpack.c.bf16 %v2480_v6, %v2480_v6  ;;  %v2926_v37 = vunpack.c.l.b16 %v3424_v31  ;;  %v2974_v51 = vsel %vm2069_vm3, %v4598_v48, %v2922_v11  ;;  %v5118_v11 = vld [vmem:[#allocation36_spill] sm:$0xff] }
 0x234   : > { %v2975_v12 = vsel %vm2071_vm4, %v4621_v7, %v2974_v51  ;;  %v1171_v61 = vcombine.high %v1163_v19, %v1163_v19  ;;  %v1172_v15 = vcombine.high %v4801_v55, %v4801_v55  ;;  %v552_v62 = vmax.f32 %v479_v28, 0.0 }
 0x235   : > { %v2155_v34 = vsel %vm3993_vm11, %v2127_v60, %v2154_v57  ;;  %v2927_v23 = vunpack.c.l.b16 %v3425_v52  ;;  %v2976_v18 = vsel %vm2073_vm5, %v4637_v53, %v2975_v12  ;;  %v4814_v8 = vsel %vm387_vm0, %v1163_v19, -inf }
 0x236   : > { %2156 = vst [vmem:[%s3965_s23 + $0x10] sm:$0xf] %v2155_v34  ;;  %v2928_v48 = vunpack.c.l.b16 %v3426_v30  ;;  %v2977_v7 = vsel %vm2075_vm6, %v2926_v37, %v2976_v18  ;;  %v4820_v39 = vsel %vm387_vm0, %v4801_v55, -inf  ;;  %v1781_v63 = vsel %vm387_vm0, %v1172_v15, -inf  ;;  %v5119_v37 = vld [vmem:[#allocation8_spill] sm:$0xff] }
 0x237   : > { %v2978_v56 = vsel %vm2077_vm7, %v2927_v23, %v2977_v7  ;;  %v4825_v49 = vsel %vm387_vm0, %v1171_v61, -inf  ;;  %v1782_v53 = vmax.f32 %v4594_v20, %v1781_v63  ;;  %v4829_v32 = vsel %vm387_vm0, %v1163_v19, inf  ;;  %v5116_v20 = vld [vmem:[#allocation13_spill] sm:$0xff]  ;;  %v5122_v63 = vld [vmem:[#allocation18_spill] sm:$0xff] }
 0x238   : > { %v2979_v40 = vsel %vm2079_vm8, %v2928_v48, %v2978_v56  ;;  %v2662_v36 = vsel %vm387_vm0, %v1172_v15, inf  ;;  %v579_v27 = vadd.f32 %v4624_v42, %v552_v62  ;;  %v613_v22 = vmul.f32 %v552_v62, %v552_v62  ;;  %v5121_v48 = vld [vmem:[#allocation31_spill] sm:$0xff] }
 0x239   : > { %v3002_v5 = vpack.c.b16 %v2979_v40, %v2979_v40  ;;  %v1783_v21 = vrot.slane %v1782_v53, 4  ;;  %v2663_v2 = vmin.f32 %v4607_v41, %v2662_v36  ;;  %v918_v47 = vcombine.high %v552_v62, %v552_v62 }
 0x23a   : > { %v580_v50 = vadd.f32 %v579_v27, %v4520_v35  ;;  %v640_v31 = vadd.f32 %v5116_v20, %v613_v22  ;;  %v925_v33 = vrot.slane %v552_v62, %v3748_v26  ;;  %v1501_v24 = vsel %vm387_vm0, %v5117_v3, -inf  ;;  %v5120_v62 = vld [vmem:[#allocation30_spill] sm:$0xff]  ;;  %v5125_v20 = vld [vmem:[#allocation15_spill] sm:$0xff] }
 0x23b   : > { %v3027_v25 = vsel %vm3993_vm11, %v3002_v5, %v3026_v45  ;;  %v1784_v6 = vmax.f32 %v1782_v53, %v1783_v21  ;;  %v2664_v42 = vrot.slane %v2663_v2, 4  ;;  %v4844_v52 = vrot.slane %v918_v47, %v3748_v26  ;;  %v5123_v53 = vld [vmem:[#allocation9_spill] sm:$0xff] }
 0x23c   : > { %3028 = vst [vmem:[%s3970_s29 + $0x10] sm:$0xf] %v3027_v25  ;;  %v581_v41 = vadd.f32 %v580_v50, %v4717_v59  ;;  %v641_v35 = vadd.f32 %v640_v31, %v5118_v11  ;;  %v933_v28 = vcombine.high %v925_v33, %v925_v33  ;;  %v1502_v58 = vsel %vm387_vm0, %v925_v33, -inf  ;;  %v5126_v11 = vld [vmem:[#allocation6_spill] sm:$0xff] }
 0x23d   : > { %v1785_v57 = vrot.slane %v1784_v6, 2  ;;  %v2665_v19 = vmin.f32 %v2663_v2, %v2664_v42  ;;  %v4852_v60 = vcombine.high %v4844_v52, %v4844_v52  ;;  %v1503_v30 = vmax.f32 %v1501_v24, %v1502_v58  ;;  %v5124_v2 = vld [vmem:[#allocation19_spill] sm:$0xff] }
 0x23e   : > { %v582_v51 = vadd.f32 %v581_v41, %v5119_v37  ;;  %v642_v12 = vadd.f32 %v641_v35, %v4735_v1  ;;  %v1511_v15 = vsel %vm387_vm0, %v933_v28, -inf  ;;  %v1519_v59 = vsel %vm387_vm0, %v5120_v62, -inf }
 0x23f   : > { %v1786_v34 = vmax.f32 %v1784_v6, %v1785_v57  ;;  %v2666_v23 = vrot.slane %v2665_v19, 2  ;;  %v1504_v18 = vrot.slane %v1503_v30, 4  ;;  %v1512_v7 = vmax.f32 %v5121_v48, %v1511_v15 }
 0x240   : > { %v583_v56 = vadd.f32 %v582_v51, %v5122_v63  ;;  %v643_v40 = vadd.f32 %v642_v12, %v5123_v53  ;;  %v1520_v45 = vsel %vm387_vm0, %v4844_v52, -inf  ;;  %v1529_v1 = vsel %vm387_vm0, %v4852_v60, -inf }
 0x241   : > { %v1787_v36 = vrot.slane %v1786_v34, 1  ;;  %v2667_v27 = vmin.f32 %v2665_v19, %v2666_v23  ;;  %v1505_v22 = vmax.f32 %v1503_v30, %v1504_v18  ;;  %v1513_v5 = vrot.slane %v1512_v7, 4  ;;  %v5127_v19 = vld [vmem:[#allocation7_spill] sm:$0xff] }
 0x242   : > { %v4867_v21 = vsel %vm387_vm0, %v1171_v61, inf  ;;  %v644_v47 = vadd.f32 %v643_v40, %v5124_v2  ;;  %v1521_v50 = vmax.f32 %v1519_v59, %v1520_v45  ;;  %v1530_v31 = vmax.f32 %v5125_v20, %v1529_v1 }
 0x243   : > { %v1788_v24 = vmax.f32 %v1786_v34, %v1787_v36  ;;  %v2668_v25 = vrot.slane %v2667_v27, 1  ;;  %v1506_v6 = vrot.slane %v1505_v22, 2  ;;  %v1514_v42 = vmax.f32 %v1512_v7, %v1513_v5  ;;  %v5128_v36 = vld [vmem:[#allocation32_spill] sm:$0xff] }
 0x244   : > { %v4873_v41 = vsel %vm387_vm0, %v4801_v55, inf  ;;  %v4876_v35 = vadd.f32 %v583_v56, %v5126_v11  ;;  %v1522_v58 = vrot.slane %v1521_v50, 4  ;;  %v1531_v57 = vrot.slane %v1530_v31, 4 }
 0x245   : > { %v3391_v61 = vpack.c.bf16 %v1788_v24, %v1788_v24  ;;  %v4879_v30 = vadd.f32 %v644_v47, %v5127_v19  ;;  %v1507_v37 = vmax.f32 %v1505_v22, %v1506_v6  ;;  %v1515_v51 = vrot.slane %v1514_v42, 2 }
 0x246   : > { %v1523_v12 = vmax.f32 %v1521_v50, %v1522_v58  ;;  %v1532_v15 = vmax.f32 %v1530_v31, %v1531_v57  ;;  %v2094_v59 = vsel %vm2071_vm4, %v4689_v0, %v4692_v10  ;;  %v2383_v55 = vsel %vm387_vm0, %v925_v33, inf }
 0x247   : > { %v4885_v34 = vmin.f32 %v2667_v27, %v2668_v25  ;;  %v1508_v23 = vrot.slane %v1507_v37, 1  ;;  %v1516_v18 = vmax.f32 %v1514_v42, %v1515_v51  ;;  %v2382_v48 = vsel %vm387_vm0, %v5117_v3, inf }
 0x248   : > { %v1524_v7 = vrot.slane %v1523_v12, 2  ;;  %v1533_v63 = vrot.slane %v1532_v15, 2  ;;  %v2384_v56 = vmin.f32 %v2382_v48, %v2383_v55  ;;  %v2392_v53 = vsel %vm387_vm0, %v933_v28, inf }
 0x249   : > { %v4890_v40 = vunpack.c.l.b16 %v3391_v61  ;;  %v1509_v45 = vmax.f32 %v1507_v37, %v1508_v23  ;;  %v1517_v1 = vrot.slane %v1516_v18, 1  ;;  %v2393_v0 = vmin.f32 %v5128_v36, %v2392_v53  ;;  %v527_v23 = vpop.f32.mrf.mxu1  ;;  %v5129_v36 = vld [vmem:[#allocation10_spill] sm:$0xff] }
 0x24a   : > { %v1525_v10 = vmax.f32 %v1523_v12, %v1524_v7  ;;  %v1534_v33 = vmax.f32 %v1532_v15, %v1533_v63  ;;  %v2385_v27 = vrot.slane %v2384_v56, 4  ;;  %v2400_v22 = vsel %vm387_vm0, %v5120_v62, inf }
 0x24b   : > { %v1518_v5 = vmax.f32 %v1516_v18, %v1517_v1  ;;  %v3360_v2 = vpack.c.bf16 %v1509_v45, %v1509_v45  ;;  %v2394_v3 = vrot.slane %v2393_v0, 4  ;;  %v2401_v47 = vsel %vm387_vm0, %v4844_v52, inf }
 0x24c   : > { %v1526_v50 = vrot.slane %v1525_v10, 1  ;;  %v1535_v28 = vrot.slane %v1534_v33, 1  ;;  %v2386_v20 = vmin.f32 %v2384_v56, %v2385_v27  ;;  %v2402_v31 = vmin.f32 %v2400_v22, %v2401_v47  ;;  %v5130_v22 = vld [vmem:[#allocation17_spill] sm:$0xff]  ;;  %v5131_v47 = vld [vmem:[#allocation26_spill] sm:$0xff] }
 0x24d   : > { %v3361_v24 = vpack.c.bf16 %v1518_v5, %v1518_v5  ;;  %v2037_v25 = vunpack.c.l.b16 %v3360_v2  ;;  %v2395_v6 = vmin.f32 %v2393_v0, %v2394_v3  ;;  %v2410_v42 = vsel %vm387_vm0, %v4852_v60, inf }
 0x24e   : > { %v1527_v11 = vmax.f32 %v1525_v10, %v1526_v50  ;;  %v1536_v58 = vmax.f32 %v1534_v33, %v1535_v28  ;;  %v2387_v57 = vrot.slane %v2386_v20, 2  ;;  %v2403_v62 = vrot.slane %v2402_v31, 4 }
 0x24f   : > { %v2038_v61 = vunpack.c.l.b16 %v3361_v24  ;;  %v2095_v19 = vsel %vm2073_vm5, %v2037_v25, %v2094_v59  ;;  %v2396_v37 = vrot.slane %v2395_v6, 2  ;;  %v2411_v52 = vmin.f32 %v4679_v4, %v2410_v42 }
 0x250   : > { %v3362_v51 = vpack.c.bf16 %v1527_v11, %v1527_v11  ;;  %v3363_v12 = vpack.c.bf16 %v1536_v58, %v1536_v58  ;;  %v2388_v15 = vmin.f32 %v2386_v20, %v2387_v57  ;;  %v2404_v55 = vmin.f32 %v2402_v31, %v2403_v62  ;;  %v5133_v11 = vld [vmem:[#allocation27_spill] sm:$0xff] }
 0x251   : > { %v2096_v18 = vsel %vm2075_vm6, %v2038_v61, %v2095_v19  ;;  %v2397_v48 = vmin.f32 %v2395_v6, %v2396_v37  ;;  %v2412_v60 = vrot.slane %v2411_v52, 4  ;;  %v2969_v7 = vsel %vm2071_vm4, %v4713_v43, %v4722_v14  ;;  %v2151_v43 = vld [vmem:[%s3965_s23 + $0xc] sm:$0xf]  ;;  %v5132_v6 = vld [vmem:[#allocation34_spill] sm:$0xff] }
 0x252   : > { %v2039_v63 = vunpack.c.l.b16 %v3362_v51  ;;  %v2040_v56 = vunpack.c.l.b16 %v3363_v12  ;;  %v2389_v59 = vrot.slane %v2388_v15, 1  ;;  %v2405_v53 = vrot.slane %v2404_v55, 2  ;;  %v5135_v12 = vld [vmem:[#allocation35_spill] sm:$0xff] }
 0x253   : > { %v2398_v45 = vrot.slane %v2397_v48, 1  ;;  %v2413_v4 = vmin.f32 %v2411_v52, %v2412_v60  ;;  %v564_v1 = vmax.f32 %v527_v23, 0.0  ;;  %v585_v0 = vadd.f32 %v4876_v35, %v5129_v36  ;;  %v5134_v52 = vld [vmem:[#allocation24_spill] sm:$0xff] }
 0x254   : > { %v2097_v10 = vsel %vm2077_vm7, %v2039_v63, %v2096_v18  ;;  %v2390_v33 = vmin.f32 %v2388_v15, %v2389_v59  ;;  %v2406_v27 = vmin.f32 %v2404_v55, %v2405_v53  ;;  %v646_v5 = vadd.f32 %v4879_v30, %v5130_v22  ;;  %v5137_v53 = vld [vmem:[#allocation25_spill] sm:$0xff] }
 0x255   : > { %v2098_v2 = vsel %vm2079_vm8, %v2040_v56, %v2097_v10  ;;  %v2399_v14 = vmin.f32 %v2397_v48, %v2398_v45  ;;  %v2414_v3 = vrot.slane %v2413_v4, 2  ;;  %v586_v50 = vadd.f32 %v585_v0, %v5131_v47  ;;  %v5136_v56 = vld [vmem:[#allocation28_spill] sm:$0xff] }
 0x256   : > { %v2126_v28 = vpack.c.b16 %v2098_v2, %v2098_v2  ;;  %v2407_v20 = vrot.slane %v2406_v27, 1  ;;  %v3416_v31 = vpack.c.bf16 %v2390_v33, %v2390_v33  ;;  %v625_v24 = vmul.f32 %v564_v1, %v564_v1 }
 0x257   : > { %v2415_v35 = vmin.f32 %v2413_v4, %v2414_v3  ;;  %v3417_v25 = vpack.c.bf16 %v2399_v14, %v2399_v14  ;;  %v587_v42 = vadd.f32 %v586_v50, %v5132_v6  ;;  %v647_v58 = vadd.f32 %v646_v5, %v5133_v11  ;;  %v5139_v5 = vld [vmem:[#allocation14_spill] sm:$0xff]  ;;  %v5140_v11 = vld [vmem:[#allocation37_spill] sm:$0xff] }
 0x258   : > { %v2152_v30 = vsel %vm3993_vm11, %v2126_v28, %v2151_v43  ;;  %v2408_v57 = vmin.f32 %v2406_v27, %v2407_v20  ;;  %v2918_v62 = vunpack.c.l.b16 %v3416_v31  ;;  %v1122_v61 = vcombine.high %v564_v1, %v564_v1 }
 0x259   : > { %2153 = vst [vmem:[%s3965_s23 + $0xc] sm:$0xf] %v2152_v30  ;;  %v2416_v19 = vrot.slane %v2415_v35, 1  ;;  %v2919_v37 = vunpack.c.l.b16 %v3417_v25  ;;  %v588_v51 = vadd.f32 %v587_v42, %v5134_v52  ;;  %v648_v15 = vadd.f32 %v647_v58, %v5135_v12  ;;  %v3023_v42 = vld [vmem:[%s3970_s29 + $0xc] sm:$0xf] }
 0x25a   : > { %v3418_v55 = vpack.c.bf16 %v2408_v57, %v2408_v57  ;;  %v2970_v23 = vsel %vm2073_vm5, %v2918_v62, %v2969_v7  ;;  %v1129_v18 = vrot.slane %v564_v1, %v3748_v26  ;;  %v1136_v48 = vrot.slane %v1122_v61, %v3748_v26  ;;  %v5138_v7 = vld [vmem:[#allocation33_spill] sm:$0xff]  ;;  %v5141_v61 = vld [vmem:[#allocation12_spill] sm:$0xff] }
 0x25b   : > { %v2417_v60 = vmin.f32 %v2415_v35, %v2416_v19  ;;  %v2971_v63 = vsel %vm2075_vm6, %v2919_v37, %v2970_v23  ;;  %v589_v59 = vadd.f32 %v588_v51, %v5136_v56  ;;  %v649_v45 = vadd.f32 %v648_v15, %v5137_v53 }
 0x25c   : > { %v2920_v4 = vunpack.c.l.b16 %v3418_v55  ;;  %v1137_v36 = vcombine.high %v1129_v18, %v1129_v18  ;;  %v1138_v0 = vcombine.high %v1136_v48, %v1136_v48  ;;  %v1744_v10 = vsel %vm387_vm0, %v1129_v18, -inf }
 0x25d   : > { %v3419_v33 = vpack.c.bf16 %v2417_v60, %v2417_v60  ;;  %v590_v27 = vadd.f32 %v589_v59, %v4628_v16  ;;  %v650_v22 = vadd.f32 %v649_v45, %v5138_v7  ;;  %v1745_v26 = vsel %vm387_vm0, %v5139_v5, -inf }
 0x25e   : > { %v2972_v2 = vsel %vm2077_vm7, %v2920_v4, %v2971_v63  ;;  %v1746_v43 = vmax.f32 %v1744_v10, %v1745_v26  ;;  %v1753_v14 = vsel %vm387_vm0, %v1137_v36, -inf  ;;  %v1762_v3 = vsel %vm387_vm0, %v1136_v48, -inf }
 0x25f   : > { %v2921_v47 = vunpack.c.l.b16 %v3419_v33  ;;  %v591_v50 = vadd.f32 %v590_v27, %v564_v1  ;;  %v651_v28 = vadd.f32 %v650_v22, %v4683_v17  ;;  %v1755_v20 = vmax.f32 %v1753_v14, %v4814_v8 }
 0x260   : > { %v1747_v16 = vrot.slane %v1746_v43, 4  ;;  %v1764_v31 = vmax.f32 %v1762_v3, %v4825_v49  ;;  %v1771_v35 = vsel %vm387_vm0, %v1138_v0, -inf  ;;  %v4941_v25 = vsel %vm2069_vm3, %v4748_v46, %v4746_v38 }
 0x261   : > { %v2973_v6 = vsel %vm2079_vm8, %v2921_v47, %v2972_v2  ;;  %v592_v1 = vadd.f32 %v591_v50, %v5140_v11  ;;  %v652_v58 = vadd.f32 %v651_v28, %v625_v24  ;;  %v1756_v17 = vrot.slane %v1755_v20, 4 }
 0x262   : > { %v3001_v30 = vpack.c.b16 %v2973_v6, %v2973_v6  ;;  %v1748_v8 = vmax.f32 %v1746_v43, %v1747_v16  ;;  %v1765_v57 = vrot.slane %v1764_v31, 4  ;;  %v1773_v49 = vmax.f32 %v1771_v35, %v4820_v39 }
 0x263   : > { %v4948_v62 = vadd.f32 %v592_v1, %v4779_v54  ;;  %v653_v19 = vadd.f32 %v652_v58, %v5141_v61  ;;  %v1757_v38 = vmax.f32 %v1755_v20, %v1756_v17  ;;  %v2625_v46 = vsel %vm387_vm0, %v1129_v18, inf }
 0x264   : > { %v3024_v37 = vsel %vm3993_vm11, %v3001_v30, %v3023_v42  ;;  %v1749_v52 = vrot.slane %v1748_v8, 2  ;;  %v1766_v51 = vmax.f32 %v1764_v31, %v1765_v57  ;;  %v1774_v24 = vrot.slane %v1773_v49, 4 }
 0x265   : > { %3025 = vst [vmem:[%s3970_s29 + $0xc] sm:$0xf] %v3024_v37  ;;  %v594_v12 = vrot.slane %v4948_v62, 4  ;;  %v4957_v15 = vadd.f32 %v653_v19, %v4796_v9  ;;  %v1758_v39 = vrot.slane %v1757_v38, 2  ;;  %v2626_v54 = vsel %vm387_vm0, %v5139_v5, inf }
 0x266   : > { %v1750_v55 = vmax.f32 %v1748_v8, %v1749_v52  ;;  %v1767_v23 = vrot.slane %v1766_v51, 2  ;;  %v1775_v60 = vmax.f32 %v1773_v49, %v1774_v24  ;;  %v2627_v18 = vmin.f32 %v2625_v46, %v2626_v54 }
 0x267   : > { %v1759_v63 = vmax.f32 %v1757_v38, %v1758_v39  ;;  %v2634_v56 = vsel %vm387_vm0, %v1137_v36, inf  ;;  %v2643_v59 = vsel %vm387_vm0, %v1136_v48, inf  ;;  %v2652_v53 = vsel %vm387_vm0, %v1138_v0, inf }
 0x268   : > { %v1751_v45 = vrot.slane %v1750_v55, 1  ;;  %v1768_v4 = vmax.f32 %v1766_v51, %v1767_v23  ;;  %v1776_v10 = vrot.slane %v1775_v60, 2  ;;  %v2628_v9 = vrot.slane %v2627_v18, 4 }
 0x269   : > { %v1760_v33 = vrot.slane %v1759_v63, 1  ;;  %v2636_v27 = vmin.f32 %v2634_v56, %v4829_v32  ;;  %v2645_v7 = vmin.f32 %v2643_v59, %v4867_v21  ;;  %v2654_v22 = vmin.f32 %v2652_v53, %v4873_v41 }
 0x26a   : > { %v1752_v5 = vmax.f32 %v1750_v55, %v1751_v45  ;;  %v1769_v26 = vrot.slane %v1768_v4, 1  ;;  %v1777_v2 = vmax.f32 %v1775_v60, %v1776_v10  ;;  %v2629_v43 = vmin.f32 %v2627_v18, %v2628_v9 }
 0x26b   : > { %v1761_v36 = vmax.f32 %v1759_v63, %v1760_v33  ;;  %v2637_v14 = vrot.slane %v2636_v27, 4  ;;  %v2646_v48 = vrot.slane %v2645_v7, 4  ;;  %v2655_v3 = vrot.slane %v2654_v22, 4  ;;  %v2163_v63 = vld [vmem:[%s3965_s23 + $0x1c] sm:$0xf] }
 0x26c   : > { %v1770_v0 = vmax.f32 %v1768_v4, %v1769_v26  ;;  %v1778_v47 = vrot.slane %v1777_v2, 1  ;;  %v3387_v50 = vpack.c.bf16 %v1752_v5, %v1752_v5  ;;  %v2630_v28 = vrot.slane %v2629_v43, 2 }
 0x26d   : > { %v3388_v20 = vpack.c.bf16 %v1761_v36, %v1761_v36  ;;  %v2638_v16 = vmin.f32 %v2636_v27, %v2637_v14  ;;  %v2647_v31 = vmin.f32 %v2645_v7, %v2646_v48  ;;  %v2656_v32 = vmin.f32 %v2654_v22, %v2655_v3 }
 0x26e   : > { %v1779_v35 = vmax.f32 %v1777_v2, %v1778_v47  ;;  %v3389_v21 = vpack.c.bf16 %v1770_v0, %v1770_v0  ;;  %v2064_v6 = vunpack.c.l.b16 %v3387_v50  ;;  %v2631_v41 = vmin.f32 %v2629_v43, %v2630_v28  ;;  %v5142_v0 = vld [vmem:[#allocation5_spill] sm:$0xff]  ;;  %v3035_v50 = vld [vmem:[%s3970_s29 + $0x1c] sm:$0xf] }
 0x26f   : > { %v2065_v42 = vunpack.c.l.b16 %v3388_v20  ;;  %v2639_v11 = vrot.slane %v2638_v16, 2  ;;  %v2648_v1 = vrot.slane %v2647_v31, 2  ;;  %v2657_v58 = vrot.slane %v2656_v32, 2 }
 0x270   : > { %v3390_v17 = vpack.c.bf16 %v1779_v35, %v1779_v35  ;;  %v2066_v30 = vunpack.c.l.b16 %v3389_v21  ;;  %v2118_v8 = vsel %vm2071_vm4, %v2064_v6, %v4941_v25  ;;  %v2632_v57 = vrot.slane %v2631_v41, 1 }
 0x271   : > { %v2119_v49 = vsel %vm2073_vm5, %v2065_v42, %v2118_v8  ;;  %v2640_v61 = vmin.f32 %v2638_v16, %v2639_v11  ;;  %v2649_v19 = vmin.f32 %v2647_v31, %v2648_v1  ;;  %v2658_v38 = vmin.f32 %v2656_v32, %v2657_v58 }
 0x272   : > { %v3447_v46 = vpack.c.bf16 %v4885_v34, %v4885_v34  ;;  %v2067_v37 = vunpack.c.l.b16 %v3390_v17  ;;  %v2120_v52 = vsel %vm2075_vm6, %v2066_v30, %v2119_v49  ;;  %v2633_v51 = vmin.f32 %v2631_v41, %v2632_v57 }
 0x273   : > { %v2641_v24 = vrot.slane %v2640_v61, 1  ;;  %v2650_v39 = vrot.slane %v2649_v19, 1  ;;  %v2659_v54 = vrot.slane %v2658_v38, 1  ;;  %v595_v25 = vadd.f32 %v594_v12, %v4948_v62 }
 0x274   : > { %v2121_v55 = vsel %vm2077_vm7, %v2067_v37, %v2120_v52  ;;  %v3443_v23 = vpack.c.bf16 %v2633_v51, %v2633_v51  ;;  %v2992_v60 = vsel %vm2069_vm3, %v4786_v29, %v4773_v13  ;;  %v655_v18 = vrot.slane %v4957_v15, 4 }
 0x275   : > { %v2122_v34 = vsel %vm2079_vm8, %v4890_v40, %v2121_v55  ;;  %v2642_v56 = vmin.f32 %v2640_v61, %v2641_v24  ;;  %v2651_v59 = vmin.f32 %v2649_v19, %v2650_v39  ;;  %v2660_v53 = vmin.f32 %v2658_v38, %v2659_v54 }
 0x276   : > { %v2130_v62 = vpack.c.b16 %v2122_v34, %v2122_v34  ;;  %v2945_v12 = vunpack.c.l.b16 %v3443_v23  ;;  %v596_v45 = vrot.slane %v595_v25, 2  ;;  %v656_v4 = vadd.f32 %v655_v18, %v4957_v15 }
 0x277   : > { %v3444_v10 = vpack.c.bf16 %v2642_v56, %v2642_v56  ;;  %v3445_v9 = vpack.c.bf16 %v2651_v59, %v2651_v59  ;;  %v3446_v13 = vpack.c.bf16 %v2660_v53, %v2660_v53  ;;  %v2949_v5 = vunpack.c.l.b16 %v3447_v46 }
 0x278   : > { %v2164_v29 = vsel %vm3993_vm11, %v2130_v62, %v2163_v63  ;;  %v2993_v33 = vsel %vm2071_vm4, %v2945_v12, %v2992_v60  ;;  %v597_v40 = vadd.f32 %v596_v45, %v595_v25  ;;  %v657_v27 = vrot.slane %v656_v4, 2 }
 0x279   : > { %2165 = vst [vmem:[%s3965_s23 + $0x1c] sm:$0xf] %v2164_v29  ;;  %v2946_v7 = vunpack.c.l.b16 %v3444_v10  ;;  %v2947_v22 = vunpack.c.l.b16 %v3445_v9  ;;  %v2948_v15 = vunpack.c.l.b16 %v3446_v13  ;;  %vm663_vm12 = vcmp.eq.s32.totalorder %v5142_v0, 0 }
 0x27a   : > { %v598_v26 = vrot.slane %v597_v40, 1  ;;  %v658_v2 = vadd.f32 %v657_v27, %v656_v4  ;;  %vm665_vm13 = vcmp.eq.s32.totalorder %v5142_v0, 1 }
 0x27b   : > { %v2994_v43 = vsel %vm2073_vm5, %v2946_v7, %v2993_v33 }
 0x27c   : > { %v2995_v36 = vsel %vm2075_vm6, %v2947_v22, %v2994_v43  ;;  %v599_v14 = vadd.f32 %v598_v26, %v597_v40  ;;  %v659_v48 = vrot.slane %v658_v2, 1 }
 0x27d   : > { %v2996_v3 = vsel %vm2077_vm7, %v2948_v15, %v2995_v36 }
 0x27e   : > { %v2997_v47 = vsel %vm2079_vm8, %v2949_v5, %v2996_v3  ;;  %v660_v28 = vadd.f32 %v659_v48, %v658_v2  ;;  %v664_v16 = vsel %vm663_vm12, %v599_v14, 0.0 }
 0x27f   : > { %v3005_v20 = vpack.c.b16 %v2997_v47, %v2997_v47 }
 0x280   : > { %v666_v31 = vsel %vm665_vm13, %v660_v28, 0.0 }
 0x281   : > { %v3036_v32 = vsel %vm3993_vm11, %v3005_v20, %v3035_v50  ;;  %v667_v35 = vadd.f32 %v666_v31, %v664_v16 }
 0x282   : > { %3037 = vst [vmem:[%s3970_s29 + $0x1c] sm:$0xf] %v3036_v32 }
 0x283   : > { %668 = vst [vmem:[%s206_s7] sm:$0xff] %v667_v35 }
 0x284   : > { %3576 = shalt.err (!%p3573_p4)
}
 0x285   : > { %s3577_s22 = scalar_lea.hbm %s5006_s11, 128  ;;  %s3581_s28 = scalar_lea.hbm %s5048_s4, 256 }
 0x286   : > { %p3578_p7 = scmp.ne.s32.totalorder %s5006_s11, %s3577_s22  ;;  %p3582_p10 = scmp.lt.s32.totalorder %s5006_s11, %s5048_s4 }
 0x287   : > { %p3583_p11 = scmp.lt.s32.totalorder %s3581_s28, %s3577_s22 }
 0x288   : > { %p3579_p8 = pnand %p3578_p7, %p3691_p5 }
 0x289   : > { %p3584_p12 = por %p3583_p11, %p3582_p10 }
 0x28a   : > { %p3580_p9 = pneg %p3579_p8 }
 0x28c   : > { %p3585_p13 = pnand %p3584_p12, %p3580_p9 }
 0x28e   : > { %3588 = shalt.err (!%p3585_p13)
}
 0x28f   : > { %3505 = dma.vmem_to_hbm [thread:$0]  (%p3691_p5), %s3071_s8, 128, %s5006_s11, %s3049_s12  }
 0x290 PF: > { %p3511_p0 = scmp.ge.s32.totalorder %s3623_s18, 2  ;;  %s3098_s5 = sand.u32 1, %s3611_s15  }
 0x291   : > { %s3099_s6 = scalar_lea.sflag [#allocation3], %s3098_s5 }
 0x292   : > { %p3508_p1 = pnand %p3511_p0, %p3695_p6 }
 0x294   : > { %p3509_p2 = pneg %p3508_p1 }
 0x296   : > { %3606 = dma.done.wait (%p3509_p2), %s3099_s6, 128  }
 0x297   : > { %3608 = vsyncadd (%p3509_p2), %s3099_s6, 4294967168  ;;  %p15_p3 = scmp.ge.s32.totalorder %s3678_s21, 4   ;;  %s5143_s15 = smov %s3615_s16 }
 0x298   : > { %s5144_s16 = smov %s3619_s17  ;;  %s5145_s17 = smov %s3689_s24 }
 0x299   : > { %s5146_s18 = smov %s3678_s21  ;;  %17 = sbr.rel (!%p15_p3) target bundleno = 3 (0x3), region = 87 }
 0x29e   :  { %3104 = vsyncpa [#allocation3], 1 }
 0x29f   :  { %3106 = vsyncpa [#allocation3 + $0x1], 1 }

</bundles_post_ra>
